<compile_context>
chip_gen: v5e
topology: v5e:2x2
jax: 0.10.0
libtpu: 0.0.40
codegen_flags: <defaults>
</compile_context>

<pallas_src>
import functools
from typing import NamedTuple

import jax
import jax.numpy as jnp
import numpy as np
from jax.experimental import pallas as pl
from jax.experimental.pallas import tpu as pltpu

# Hyper-parameters mirroring the PyTorch module's globals / __init__.
HIDDEN_SIZE = 64      # LSTM hidden size (module hard-codes 64*2 in the reshape)
INPUT_SIZE = 1        # Conv1d in_channels
KERNEL_SIZE = 4       # Conv1d kernel_size
POOL_SIZE = 3         # MaxPool1d kernel_size (stride = kernel_size)
CONV_CH = 32          # Conv1d out_channels
FC_OUT = 168          # Linear out_features

# TPU-friendly padded layout constants.
# TODO(synk): for real workloads raise B_TILE (>=128 on v5e, >=256 on v6e/v7x)
# to fill MXU rows and amortize the ~0.35us/step grid overhead.
B_TILE = 8            # batch tile (f32 sublane multiple); grid axis over batch
CONV_PAD = 128        # conv channels padded 32 -> 128 (full-vreg lane blocks)
GATE_PAD = 128        # each LSTM gate padded 64 -> 128 lanes (aligned slices)
FC_PAD = 256          # FC outputs padded 168 -> 256 (unmasked lane-dense store)


# ----------------------------------------------------------------------------
# Fused kernel: banded-conv matmul + ReLU + maxpool + biLSTM(last step) + FC
# ----------------------------------------------------------------------------
def _cnn_lstm_kernel(x_ref, wband_ref, bband_ref, wih_f_ref, bih_f_ref,
                     wih_b_ref, bih_b_ref, whh_ref, wfc_ref, bfc_ref, out_ref,
                     *, seq_len, pool, btile, gp, cpad):
    # --- Conv1d(k=4) + ReLU as ONE banded (Toeplitz) matmul, lane-dense ------
    # x: (btile, L) bf16 @ band: (L, T*cpad) bf16 -> f32, T = seq_len*pool
    xb = x_ref[...].astype(jnp.bfloat16)
    g = jnp.dot(xb, wband_ref[...],
                preferred_element_type=jnp.float32) + bband_ref[...]
    g = jnp.maximum(g, 0.0)

    # --- MaxPool1d(pool): max over 128-lane-aligned channel blocks -----------
    feats = []
    for p_ in range(seq_len):
        m = g[:, (p_ * pool) * cpad:(p_ * pool + 1) * cpad]
        for q in range(1, pool):
            lo = (p_ * pool + q) * cpad
            m = jnp.maximum(m, g[:, lo:lo + cpad])
        feats.append(m)                                    # (btile, cpad) f32
    seq_all = jnp.concatenate(feats, axis=0).astype(jnp.bfloat16)  # (S*btile,cpad)

    # --- Hoisted input projection: FORWARD gates for all S steps at once -----
    gates_f = jnp.dot(seq_all, wih_f_ref[...],
                      preferred_element_type=jnp.float32) + bih_f_ref[...]
    # Reverse gates only for the LAST timestep block (only consumer).
    last = seq_all[(seq_len - 1) * btile:seq_len * btile, :]
    gates_b = jnp.dot(last, wih_b_ref[...],
                      preferred_element_type=jnp.float32) + bih_b_ref[...]

    def split(gg):  # PyTorch gate order i, f, g, o; each gate is 128 lanes wide
        i = jax.nn.sigmoid(gg[:, 0:gp])
        f = jax.nn.sigmoid(gg[:, gp:2 * gp])
        cc = jnp.tanh(gg[:, 2 * gp:3 * gp])
        o = jax.nn.sigmoid(gg[:, 3 * gp:4 * gp])
        return i, f, cc, o

    # --- Forward recurrence, fully unrolled (seq_len static & tiny) ----------
    whh = whh_ref[...]                                     # bf16 (gp, 4*gp)
    h = jnp.zeros((btile, gp), jnp.float32)
    c = jnp.zeros((btile, gp), jnp.float32)
    for t in range(seq_len):
        gt = (gates_f[t * btile:(t + 1) * btile, :]
              + jnp.dot(h.astype(jnp.bfloat16), whh,
                        preferred_element_type=jnp.float32))
        i, f, cc, o = split(gt)
        c = f * c + i * cc
        h = o * jnp.tanh(c)

    # --- Reverse direction: the module only reads outs[:, -1, :]; the reverse
    # LSTM's output at the LAST time step is its FIRST scan step: one cell on
    # x[S-1] from zero (h, c); weight_hh_l0_reverse never contributes.
    ib, _fb, ccb, ob = split(gates_b)
    hb = ob * jnp.tanh(ib * ccb)

    # --- temp[:, -1, :] -> Linear (output padded to 256 lanes, unmasked store)
    z = jnp.concatenate([h, hb], axis=1).astype(jnp.bfloat16)   # (btile, 2*gp)
    out_ref[...] = (jnp.dot(z, wfc_ref[...],
                            preferred_element_type=jnp.float32) + bfc_ref[...])


# ----------------------------------------------------------------------------
# ONE-TIME parameter preparation (host-side numpy; NOT in the per-call path).
# ----------------------------------------------------------------------------
class PreparedParams(NamedTuple):
    wband: jax.Array   # (L, T*CONV_PAD)        bf16  Toeplitz conv band
    bband: jax.Array   # (1, T*CONV_PAD)        f32
    wih_f: jax.Array   # (CONV_PAD, 4*GATE_PAD) bf16  forward gate input proj
    bih_f: jax.Array   # (1, 4*GATE_PAD)        f32   (bias_ih + bias_hh)
    wih_b: jax.Array   # (CONV_PAD, 4*GATE_PAD) bf16  reverse gate input proj
    bih_b: jax.Array   # (1, 4*GATE_PAD)        f32   (bias_ih + bias_hh)
    whh:   jax.Array   # (GATE_PAD, 4*GATE_PAD) bf16  forward hidden proj
    wfc:   jax.Array   # (2*GATE_PAD, FC_PAD)   bf16
    bfc:   jax.Array   # (1, FC_PAD)            f32


def _build_banded_conv(w_conv, b_conv, L, T):
    """(K, 32) conv weight -> (L, T*CONV_PAD) Toeplitz band + tiled bias."""
    # TODO(synk): the band is O(L^2); for L beyond a few hundred (hits v7x's
    # 64 MiB VMEM first) switch to im2col (B, T, K) @ (K, CONV_PAD) or tile T.
    w = np.asarray(w_conv, np.float32)                # (K, C)
    b = np.asarray(b_conv, np.float32).reshape(-1)    # (C,)
    K, C = w.shape
    band = np.zeros((L, T, CONV_PAD), np.float32)
    for t in range(T):
        band[t:t + K, t, :C] = w
    bband = np.zeros((1, T, CONV_PAD), np.float32)
    bband[0, :, :C] = b
    return (jnp.asarray(band.reshape(L, T * CONV_PAD), jnp.bfloat16),
            jnp.asarray(bband.reshape(1, T * CONV_PAD), jnp.float32))


def _pad_gates(w, rows_pad, dtype):
    """(rows, 4*H) gate-ordered weight/bias -> (rows_pad, 4*GATE_PAD), zero pad."""
    w = np.asarray(w, np.float32)
    rows, four_h = w.shape
    H = four_h // 4
    out = np.zeros((rows_pad, 4 * GATE_PAD), np.float32)
    for k in range(4):
        out[:rows, k * GATE_PAD:k * GATE_PAD + H] = w[:, k * H:(k + 1) * H]
    return jnp.asarray(out, dtype)


def _pad_fc(wfc, bfc):
    wfc = np.asarray(wfc, np.float32)
    bfc = np.asarray(bfc, np.float32).reshape(1, -1)
    H = HIDDEN_SIZE
    wp = np.zeros((2 * GATE_PAD, FC_PAD), np.float32)
    wp[0:H, :FC_OUT] = wfc[0:H]                           # forward hidden rows
    wp[GATE_PAD:GATE_PAD + H, :FC_OUT] = wfc[H:2 * H]     # reverse hidden rows
    bp = np.zeros((1, FC_PAD), np.float32)
    bp[:, :FC_OUT] = bfc
    return jnp.asarray(wp, jnp.bfloat16), jnp.asarray(bp, jnp.float32)


def prepare_params(params, L):
    """One-time conversion of PyTorch-layout params into padded TPU slabs.

    PRECONDITION (load-bearing): b_f / b_b must already be bias_ih_l0 +
    bias_hh_l0 (resp. _reverse) summed at the PyTorch conversion boundary.
    """
    (w_conv, b_conv, wih_f, whh_f, b_f, wih_b, _whh_b, b_b, wfc, bfc) = params
    n_conv = L - KERNEL_SIZE + 1
    S = n_conv // POOL_SIZE
    T = S * POOL_SIZE
    assert S >= 1, "input too short for Conv1d(k=4) + MaxPool1d(3)"
    wband, bband = _build_banded_conv(w_conv, b_conv, L, T)
    wfc_p, bfc_p = _pad_fc(wfc, bfc)
    return PreparedParams(
        wband=wband, bband=bband,
        wih_f=_pad_gates(wih_f, CONV_PAD, jnp.bfloat16),
        bih_f=_pad_gates(b_f, 1, jnp.float32),
        wih_b=_pad_gates(wih_b, CONV_PAD, jnp.bfloat16),
        bih_b=_pad_gates(b_b, 1, jnp.float32),
        whh=_pad_gates(whh_f, GATE_PAD, jnp.bfloat16),
        wfc=wfc_p, bfc=bfc_p)


# ----------------------------------------------------------------------------
# Forward pass: pad input, launch the fused kernel over a parallel batch grid.
# ----------------------------------------------------------------------------
@jax.jit
def cnn_lstm_forward(x, prep: PreparedParams):
    """x: (B, 1, L) NCW float; prep: output of prepare_params(params, L)."""
    B, _, L = x.shape
    n_conv = L - KERNEL_SIZE + 1
    S = n_conv // POOL_SIZE            # pooled sequence length (floor, like PyTorch)
    T = S * POOL_SIZE                  # conv positions actually consumed
    assert prep.wband.shape == (L, T * CONV_PAD), \
        "prepare_params() was built for a different input length L"

    nb = pl.cdiv(B, B_TILE)            # batch tiles (grid axis, megacore-parallel)
    Bp = nb * B_TILE
    xp = jnp.zeros((Bp, L), jnp.float32).at[:B, :].set(x[:, 0, :].astype(jnp.float32))

    kernel = functools.partial(_cnn_lstm_kernel, seq_len=S, pool=POOL_SIZE,
                               btile=B_TILE, gp=GATE_PAD, cpad=CONV_PAD)
    out_pad = pl.pallas_call(
        kernel,
        out_shape=jax.ShapeDtypeStruct((Bp, FC_PAD), jnp.float32),
        grid=(nb,),
        in_specs=[
            pl.BlockSpec((B_TILE, L), lambda i: (i, 0)),
            # weights: constant index_map -> fetched once, VMEM-resident
            pl.BlockSpec((L, T * CONV_PAD), lambda i: (0, 0)),
            pl.BlockSpec((1, T * CONV_PAD), lambda i: (0, 0)),
            pl.BlockSpec((CONV_PAD, 4 * GATE_PAD), lambda i: (0, 0)),
            pl.BlockSpec((1, 4 * GATE_PAD), lambda i: (0, 0)),
            pl.BlockSpec((CONV_PAD, 4 * GATE_PAD), lambda i: (0, 0)),
            pl.BlockSpec((1, 4 * GATE_PAD), lambda i: (0, 0)),
            pl.BlockSpec((GATE_PAD, 4 * GATE_PAD), lambda i: (0, 0)),
            pl.BlockSpec((2 * GATE_PAD, FC_PAD), lambda i: (0, 0)),
            pl.BlockSpec((1, FC_PAD), lambda i: (0, 0)),
        ],
        out_specs=pl.BlockSpec((B_TILE, FC_PAD), lambda i: (i, 0)),
        compiler_params=pltpu.CompilerParams(
            dimension_semantics=("parallel",)),
    )(xp, prep.wband, prep.bband, prep.wih_f, prep.bih_f,
      prep.wih_b, prep.bih_b, prep.whh, prep.wfc, prep.bfc)
    return out_pad[:B, :FC_OUT]


# ----------------------------------------------------------------------------
# Pure-JAX reference (full bidirectional recurrence, f32) for validation.
# ----------------------------------------------------------------------------
def reference_forward(x, params):
    (w_conv, b_conv, wih_f, whh_f, b_f, wih_b, whh_b, b_b, wfc, bfc) = params
    B, _, L = x.shape
    xs = x[:, 0, :]
    l_conv = L - KERNEL_SIZE + 1
    conv = jnp.stack([xs[:, t:t + KERNEL_SIZE] @ w_conv for t in range(l_conv)],
                     axis=1) + b_conv                                # (B, Lc, 32)
    relu = jnp.maximum(conv, 0.0)
    s = l_conv // POOL_SIZE
    pooled = relu[:, :s * POOL_SIZE, :].reshape(B, s, POOL_SIZE, CONV_CH).max(axis=2)

    H = HIDDEN_SIZE

    def cell(x_t, h, c, wih, whh, b):
        g = x_t @ wih + h @ whh + b
        i = jax.nn.sigmoid(g[:, :H]); f = jax.nn.sigmoid(g[:, H:2 * H])
        gg = jnp.tanh(g[:, 2 * H:3 * H]); o = jax.nn.sigmoid(g[:, 3 * H:])
        c = f * c + i * gg
        return o * jnp.tanh(c), c

    h = c = jnp.zeros((B, H), jnp.float32)
    fwd = []
    for t in range(s):
        h, c = cell(pooled[:, t, :], h, c, wih_f, whh_f, b_f)
        fwd.append(h)
    h = c = jnp.zeros((B, H), jnp.float32)
    bwd = [None] * s
    for t in range(s - 1, -1, -1):
        h, c = cell(pooled[:, t, :], h, c, wih_b, whh_b, b_b)
        bwd[t] = h
    temp_last = jnp.concatenate([fwd[-1], bwd[-1]], axis=1)          # (B, 128)
    return temp_last @ wfc + bfc


if __name__ == "__main__":
    # Deterministic synthetic parameters (shapes mirror the PyTorch module).
    key = jax.random.PRNGKey(0)
    ks = jax.random.split(key, 12)

    def init(k, shape, scale=0.1):
        return scale * jax.random.normal(k, shape, dtype=jnp.float32)

    H4 = 4 * HIDDEN_SIZE
    w_conv = init(ks[0], (KERNEL_SIZE, CONV_CH))      # Conv1d weight (32,1,4) -> (4,32)
    b_conv = init(ks[1], (1, CONV_CH))
    wih_f = init(ks[2], (CONV_CH, H4))                # weight_ih_l0^T
    whh_f = init(ks[3], (HIDDEN_SIZE, H4))            # weight_hh_l0^T
    b_f = init(ks[4], (1, H4))                        # bias_ih_l0 + bias_hh_l0 combined
    wih_b = init(ks[5], (CONV_CH, H4))                # weight_ih_l0_reverse^T
    whh_b = init(ks[6], (HIDDEN_SIZE, H4))            # only used by the reference check
    b_b = init(ks[7], (1, H4))                        # bias_ih+bias_hh (reverse) combined
    wfc = init(ks[8], (2 * HIDDEN_SIZE, FC_OUT))      # Linear weight (168,128)^T
    bfc = init(ks[9], (1, FC_OUT))
    params = (w_conv, b_conv, wih_f, whh_f, b_f, wih_b, whh_b, b_b, wfc, bfc)

    # Example input, NCW like the PyTorch module: (B=2, C=1, L=16).
    x = jax.random.normal(ks[10], (2, INPUT_SIZE, 16), dtype=jnp.float32)

    # TODO(synk): nn.LSTM dropout=0.2 with num_layers=1 is a no-op (inter-layer
    # dropout only), so it is intentionally omitted.
    prep = prepare_params(params, L=x.shape[-1])      # ONE-TIME weight prep
    out = cnn_lstm_forward(x, prep)
    out = jax.block_until_ready(out)

    ref = reference_forward(x, params)
    # Tolerance reflects bf16 matmul operands with f32 accumulation.
    np.testing.assert_allclose(np.asarray(out), np.asarray(ref), rtol=1e-2, atol=1e-2)
    assert out.shape == (2, FC_OUT)
    print("KERNEL_OK")
</pallas_src>

<mosaic_0001>
module attributes {stable_mosaic.version = 11 : i64} {
  func.func @_cnn_lstm_kernel(%arg0: i32, %arg1: memref<8x16xf32, #tpu.memory_space<vmem>>, %arg2: memref<16x1536xbf16, #tpu.memory_space<vmem>>, %arg3: memref<1x1536xf32, #tpu.memory_space<vmem>>, %arg4: memref<128x512xbf16, #tpu.memory_space<vmem>>, %arg5: memref<1x512xf32, #tpu.memory_space<vmem>>, %arg6: memref<128x512xbf16, #tpu.memory_space<vmem>>, %arg7: memref<1x512xf32, #tpu.memory_space<vmem>>, %arg8: memref<128x512xbf16, #tpu.memory_space<vmem>>, %arg9: memref<256x256xbf16, #tpu.memory_space<vmem>>, %arg10: memref<1x256xf32, #tpu.memory_space<vmem>>, %arg11: memref<8x256xf32, #tpu.memory_space<vmem>>) attributes {dimension_semantics = [#tpu.dimension_semantics<parallel>], iteration_bounds = array<i64: 1>, scalar_prefetch = 0 : i64, scratch_operands = 0 : i64, tpu.core_type = #tpu.core_type<tc>, window_params = [{transform_indices = @transform_0, window_bounds = array<i64: 8, 16>}, {pipeline_mode = #tpu.pipeline_mode<synchronous>, transform_indices = @transform_1, window_bounds = array<i64: 16, 1536>}, {pipeline_mode = #tpu.pipeline_mode<synchronous>, transform_indices = @transform_2, window_bounds = array<i64: 1, 1536>}, {pipeline_mode = #tpu.pipeline_mode<synchronous>, transform_indices = @transform_3, window_bounds = array<i64: 128, 512>}, {pipeline_mode = #tpu.pipeline_mode<synchronous>, transform_indices = @transform_4, window_bounds = array<i64: 1, 512>}, {pipeline_mode = #tpu.pipeline_mode<synchronous>, transform_indices = @transform_5, window_bounds = array<i64: 128, 512>}, {pipeline_mode = #tpu.pipeline_mode<synchronous>, transform_indices = @transform_6, window_bounds = array<i64: 1, 512>}, {pipeline_mode = #tpu.pipeline_mode<synchronous>, transform_indices = @transform_7, window_bounds = array<i64: 128, 512>}, {pipeline_mode = #tpu.pipeline_mode<synchronous>, transform_indices = @transform_8, window_bounds = array<i64: 256, 256>}, {pipeline_mode = #tpu.pipeline_mode<synchronous>, transform_indices = @transform_9, window_bounds = array<i64: 1, 256>}, {transform_indices = @transform_10, window_bounds = array<i64: 8, 256>}]} {
    %c0 = arith.constant 0 : index
    %c0_0 = arith.constant 0 : index
    %0 = vector.load %arg1[%c0, %c0_0] : memref<8x16xf32, #tpu.memory_space<vmem>>, vector<8x16xf32>
    %1 = arith.truncf %0 : vector<8x16xf32> to vector<8x16xbf16>
    %c0_1 = arith.constant 0 : index
    %c0_2 = arith.constant 0 : index
    %2 = vector.load %arg2[%c0_1, %c0_2] : memref<16x1536xbf16, #tpu.memory_space<vmem>>, vector<16x1536xbf16>
    %cst = arith.constant dense<0.000000e+00> : vector<8x1536xf32>
    %3 = tpu.matmul %1, %2, %cst {dimension_numbers = #tpu.dot_dimension_numbers<[1], [0], [0], [1], [0, 0, 1, 1], [], []>} : vector<8x16xbf16>, vector<16x1536xbf16>, vector<8x1536xf32> -> vector<8x1536xf32>
    %c0_3 = arith.constant 0 : index
    %c0_4 = arith.constant 0 : index
    %4 = vector.load %arg3[%c0_3, %c0_4] : memref<1x1536xf32, #tpu.memory_space<vmem>>, vector<1x1536xf32>
    %5 = vector.broadcast %4 : vector<1x1536xf32> to vector<8x1536xf32>
    %6 = arith.addf %3, %5 : vector<8x1536xf32>
    %cst_5 = arith.constant 0.000000e+00 : f32
    %7 = vector.broadcast %cst_5 : f32 to vector<8x1536xf32>
    %8 = arith.maximumf %6, %7 : vector<8x1536xf32>
    %9 = vector.extract_strided_slice %8 {offsets = [0, 0], sizes = [8, 128], strides = [1, 1]} : vector<8x1536xf32> to vector<8x128xf32>
    %10 = vector.extract_strided_slice %8 {offsets = [0, 128], sizes = [8, 128], strides = [1, 1]} : vector<8x1536xf32> to vector<8x128xf32>
    %11 = arith.maximumf %9, %10 : vector<8x128xf32>
    %12 = vector.extract_strided_slice %8 {offsets = [0, 256], sizes = [8, 128], strides = [1, 1]} : vector<8x1536xf32> to vector<8x128xf32>
    %13 = arith.maximumf %11, %12 : vector<8x128xf32>
    %14 = vector.extract_strided_slice %8 {offsets = [0, 384], sizes = [8, 128], strides = [1, 1]} : vector<8x1536xf32> to vector<8x128xf32>
    %15 = vector.extract_strided_slice %8 {offsets = [0, 512], sizes = [8, 128], strides = [1, 1]} : vector<8x1536xf32> to vector<8x128xf32>
    %16 = arith.maximumf %14, %15 : vector<8x128xf32>
    %17 = vector.extract_strided_slice %8 {offsets = [0, 640], sizes = [8, 128], strides = [1, 1]} : vector<8x1536xf32> to vector<8x128xf32>
    %18 = arith.maximumf %16, %17 : vector<8x128xf32>
    %19 = vector.extract_strided_slice %8 {offsets = [0, 768], sizes = [8, 128], strides = [1, 1]} : vector<8x1536xf32> to vector<8x128xf32>
    %20 = vector.extract_strided_slice %8 {offsets = [0, 896], sizes = [8, 128], strides = [1, 1]} : vector<8x1536xf32> to vector<8x128xf32>
    %21 = arith.maximumf %19, %20 : vector<8x128xf32>
    %22 = vector.extract_strided_slice %8 {offsets = [0, 1024], sizes = [8, 128], strides = [1, 1]} : vector<8x1536xf32> to vector<8x128xf32>
    %23 = arith.maximumf %21, %22 : vector<8x128xf32>
    %24 = vector.extract_strided_slice %8 {offsets = [0, 1152], sizes = [8, 128], strides = [1, 1]} : vector<8x1536xf32> to vector<8x128xf32>
    %25 = vector.extract_strided_slice %8 {offsets = [0, 1280], sizes = [8, 128], strides = [1, 1]} : vector<8x1536xf32> to vector<8x128xf32>
    %26 = arith.maximumf %24, %25 : vector<8x128xf32>
    %27 = vector.extract_strided_slice %8 {offsets = [0, 1408], sizes = [8, 128], strides = [1, 1]} : vector<8x1536xf32> to vector<8x128xf32>
    %28 = arith.maximumf %26, %27 : vector<8x128xf32>
    %29 = tpu.concatenate %13, %18, %23, %28 in 0 : vector<8x128xf32>, vector<8x128xf32>, vector<8x128xf32>, vector<8x128xf32> -> vector<32x128xf32>
    %30 = arith.truncf %29 : vector<32x128xf32> to vector<32x128xbf16>
    %c0_6 = arith.constant 0 : index
    %c0_7 = arith.constant 0 : index
    %31 = vector.load %arg4[%c0_6, %c0_7] : memref<128x512xbf16, #tpu.memory_space<vmem>>, vector<128x512xbf16>
    %cst_8 = arith.constant dense<0.000000e+00> : vector<32x512xf32>
    %32 = tpu.matmul %30, %31, %cst_8 {dimension_numbers = #tpu.dot_dimension_numbers<[1], [0], [0], [1], [0, 0, 1, 1], [], []>} : vector<32x128xbf16>, vector<128x512xbf16>, vector<32x512xf32> -> vector<32x512xf32>
    %c0_9 = arith.constant 0 : index
    %c0_10 = arith.constant 0 : index
    %33 = vector.load %arg5[%c0_9, %c0_10] : memref<1x512xf32, #tpu.memory_space<vmem>>, vector<1x512xf32>
    %34 = vector.broadcast %33 : vector<1x512xf32> to vector<32x512xf32>
    %35 = arith.addf %32, %34 : vector<32x512xf32>
    %36 = vector.extract_strided_slice %30 {offsets = [24, 0], sizes = [8, 128], strides = [1, 1]} : vector<32x128xbf16> to vector<8x128xbf16>
    %c0_11 = arith.constant 0 : index
    %c0_12 = arith.constant 0 : index
    %37 = vector.load %arg6[%c0_11, %c0_12] : memref<128x512xbf16, #tpu.memory_space<vmem>>, vector<128x512xbf16>
    %cst_13 = arith.constant dense<0.000000e+00> : vector<8x512xf32>
    %38 = tpu.matmul %36, %37, %cst_13 {dimension_numbers = #tpu.dot_dimension_numbers<[1], [0], [0], [1], [0, 0, 1, 1], [], []>} : vector<8x128xbf16>, vector<128x512xbf16>, vector<8x512xf32> -> vector<8x512xf32>
    %c0_14 = arith.constant 0 : index
    %c0_15 = arith.constant 0 : index
    %39 = vector.load %arg7[%c0_14, %c0_15] : memref<1x512xf32, #tpu.memory_space<vmem>>, vector<1x512xf32>
    %40 = vector.broadcast %39 : vector<1x512xf32> to vector<8x512xf32>
    %41 = arith.addf %38, %40 : vector<8x512xf32>
    %c0_16 = arith.constant 0 : index
    %c0_17 = arith.constant 0 : index
    %42 = vector.load %arg8[%c0_16, %c0_17] : memref<128x512xbf16, #tpu.memory_space<vmem>>, vector<128x512xbf16>
    %cst_18 = arith.constant 0.000000e+00 : f32
    %43 = vector.broadcast %cst_18 : f32 to vector<8x128xf32>
    %cst_19 = arith.constant 0.000000e+00 : f32
    %44 = vector.broadcast %cst_19 : f32 to vector<8x128xf32>
    %45 = vector.extract_strided_slice %35 {offsets = [0, 0], sizes = [8, 512], strides = [1, 1]} : vector<32x512xf32> to vector<8x512xf32>
    %46 = arith.truncf %43 : vector<8x128xf32> to vector<8x128xbf16>
    %cst_20 = arith.constant dense<0.000000e+00> : vector<8x512xf32>
    %47 = tpu.matmul %46, %42, %cst_20 {dimension_numbers = #tpu.dot_dimension_numbers<[1], [0], [0], [1], [0, 0, 1, 1], [], []>} : vector<8x128xbf16>, vector<128x512xbf16>, vector<8x512xf32> -> vector<8x512xf32>
    %48 = arith.addf %45, %47 : vector<8x512xf32>
    %49 = vector.extract_strided_slice %48 {offsets = [0, 0], sizes = [8, 128], strides = [1, 1]} : vector<8x512xf32> to vector<8x128xf32>
    %50 = arith.negf %49 : vector<8x128xf32>
    %51 = math.exp %50 : vector<8x128xf32>
    %cst_21 = arith.constant 1.000000e+00 : f32
    %52 = vector.broadcast %cst_21 : f32 to vector<8x128xf32>
    %53 = arith.addf %52, %51 : vector<8x128xf32>
    %54 = arith.divf %52, %53 : vector<8x128xf32>
    %55 = vector.extract_strided_slice %48 {offsets = [0, 128], sizes = [8, 128], strides = [1, 1]} : vector<8x512xf32> to vector<8x128xf32>
    %56 = arith.negf %55 : vector<8x128xf32>
    %57 = math.exp %56 : vector<8x128xf32>
    %cst_22 = arith.constant 1.000000e+00 : f32
    %58 = vector.broadcast %cst_22 : f32 to vector<8x128xf32>
    %59 = arith.addf %58, %57 : vector<8x128xf32>
    %60 = arith.divf %58, %59 : vector<8x128xf32>
    %61 = vector.extract_strided_slice %48 {offsets = [0, 256], sizes = [8, 128], strides = [1, 1]} : vector<8x512xf32> to vector<8x128xf32>
    %62 = math.tanh %61 : vector<8x128xf32>
    %63 = vector.extract_strided_slice %48 {offsets = [0, 384], sizes = [8, 128], strides = [1, 1]} : vector<8x512xf32> to vector<8x128xf32>
    %64 = arith.negf %63 : vector<8x128xf32>
    %65 = math.exp %64 : vector<8x128xf32>
    %cst_23 = arith.constant 1.000000e+00 : f32
    %66 = vector.broadcast %cst_23 : f32 to vector<8x128xf32>
    %67 = arith.addf %66, %65 : vector<8x128xf32>
    %68 = arith.divf %66, %67 : vector<8x128xf32>
    %69 = arith.mulf %60, %44 : vector<8x128xf32>
    %70 = arith.mulf %54, %62 : vector<8x128xf32>
    %71 = arith.addf %69, %70 : vector<8x128xf32>
    %72 = math.tanh %71 : vector<8x128xf32>
    %73 = arith.mulf %68, %72 : vector<8x128xf32>
    %74 = vector.extract_strided_slice %35 {offsets = [8, 0], sizes = [8, 512], strides = [1, 1]} : vector<32x512xf32> to vector<8x512xf32>
    %75 = arith.truncf %73 : vector<8x128xf32> to vector<8x128xbf16>
    %cst_24 = arith.constant dense<0.000000e+00> : vector<8x512xf32>
    %76 = tpu.matmul %75, %42, %cst_24 {dimension_numbers = #tpu.dot_dimension_numbers<[1], [0], [0], [1], [0, 0, 1, 1], [], []>} : vector<8x128xbf16>, vector<128x512xbf16>, vector<8x512xf32> -> vector<8x512xf32>
    %77 = arith.addf %74, %76 : vector<8x512xf32>
    %78 = vector.extract_strided_slice %77 {offsets = [0, 0], sizes = [8, 128], strides = [1, 1]} : vector<8x512xf32> to vector<8x128xf32>
    %79 = arith.negf %78 : vector<8x128xf32>
    %80 = math.exp %79 : vector<8x128xf32>
    %cst_25 = arith.constant 1.000000e+00 : f32
    %81 = vector.broadcast %cst_25 : f32 to vector<8x128xf32>
    %82 = arith.addf %81, %80 : vector<8x128xf32>
    %83 = arith.divf %81, %82 : vector<8x128xf32>
    %84 = vector.extract_strided_slice %77 {offsets = [0, 128], sizes = [8, 128], strides = [1, 1]} : vector<8x512xf32> to vector<8x128xf32>
    %85 = arith.negf %84 : vector<8x128xf32>
    %86 = math.exp %85 : vector<8x128xf32>
    %cst_26 = arith.constant 1.000000e+00 : f32
    %87 = vector.broadcast %cst_26 : f32 to vector<8x128xf32>
    %88 = arith.addf %87, %86 : vector<8x128xf32>
    %89 = arith.divf %87, %88 : vector<8x128xf32>
    %90 = vector.extract_strided_slice %77 {offsets = [0, 256], sizes = [8, 128], strides = [1, 1]} : vector<8x512xf32> to vector<8x128xf32>
    %91 = math.tanh %90 : vector<8x128xf32>
    %92 = vector.extract_strided_slice %77 {offsets = [0, 384], sizes = [8, 128], strides = [1, 1]} : vector<8x512xf32> to vector<8x128xf32>
    %93 = arith.negf %92 : vector<8x128xf32>
    %94 = math.exp %93 : vector<8x128xf32>
    %cst_27 = arith.constant 1.000000e+00 : f32
    %95 = vector.broadcast %cst_27 : f32 to vector<8x128xf32>
    %96 = arith.addf %95, %94 : vector<8x128xf32>
    %97 = arith.divf %95, %96 : vector<8x128xf32>
    %98 = arith.mulf %89, %71 : vector<8x128xf32>
    %99 = arith.mulf %83, %91 : vector<8x128xf32>
    %100 = arith.addf %98, %99 : vector<8x128xf32>
    %101 = math.tanh %100 : vector<8x128xf32>
    %102 = arith.mulf %97, %101 : vector<8x128xf32>
    %103 = vector.extract_strided_slice %35 {offsets = [16, 0], sizes = [8, 512], strides = [1, 1]} : vector<32x512xf32> to vector<8x512xf32>
    %104 = arith.truncf %102 : vector<8x128xf32> to vector<8x128xbf16>
    %cst_28 = arith.constant dense<0.000000e+00> : vector<8x512xf32>
    %105 = tpu.matmul %104, %42, %cst_28 {dimension_numbers = #tpu.dot_dimension_numbers<[1], [0], [0], [1], [0, 0, 1, 1], [], []>} : vector<8x128xbf16>, vector<128x512xbf16>, vector<8x512xf32> -> vector<8x512xf32>
    %106 = arith.addf %103, %105 : vector<8x512xf32>
    %107 = vector.extract_strided_slice %106 {offsets = [0, 0], sizes = [8, 128], strides = [1, 1]} : vector<8x512xf32> to vector<8x128xf32>
    %108 = arith.negf %107 : vector<8x128xf32>
    %109 = math.exp %108 : vector<8x128xf32>
    %cst_29 = arith.constant 1.000000e+00 : f32
    %110 = vector.broadcast %cst_29 : f32 to vector<8x128xf32>
    %111 = arith.addf %110, %109 : vector<8x128xf32>
    %112 = arith.divf %110, %111 : vector<8x128xf32>
    %113 = vector.extract_strided_slice %106 {offsets = [0, 128], sizes = [8, 128], strides = [1, 1]} : vector<8x512xf32> to vector<8x128xf32>
    %114 = arith.negf %113 : vector<8x128xf32>
    %115 = math.exp %114 : vector<8x128xf32>
    %cst_30 = arith.constant 1.000000e+00 : f32
    %116 = vector.broadcast %cst_30 : f32 to vector<8x128xf32>
    %117 = arith.addf %116, %115 : vector<8x128xf32>
    %118 = arith.divf %116, %117 : vector<8x128xf32>
    %119 = vector.extract_strided_slice %106 {offsets = [0, 256], sizes = [8, 128], strides = [1, 1]} : vector<8x512xf32> to vector<8x128xf32>
    %120 = math.tanh %119 : vector<8x128xf32>
    %121 = vector.extract_strided_slice %106 {offsets = [0, 384], sizes = [8, 128], strides = [1, 1]} : vector<8x512xf32> to vector<8x128xf32>
    %122 = arith.negf %121 : vector<8x128xf32>
    %123 = math.exp %122 : vector<8x128xf32>
    %cst_31 = arith.constant 1.000000e+00 : f32
    %124 = vector.broadcast %cst_31 : f32 to vector<8x128xf32>
    %125 = arith.addf %124, %123 : vector<8x128xf32>
    %126 = arith.divf %124, %125 : vector<8x128xf32>
    %127 = arith.mulf %118, %100 : vector<8x128xf32>
    %128 = arith.mulf %112, %120 : vector<8x128xf32>
    %129 = arith.addf %127, %128 : vector<8x128xf32>
    %130 = math.tanh %129 : vector<8x128xf32>
    %131 = arith.mulf %126, %130 : vector<8x128xf32>
    %132 = vector.extract_strided_slice %35 {offsets = [24, 0], sizes = [8, 512], strides = [1, 1]} : vector<32x512xf32> to vector<8x512xf32>
    %133 = arith.truncf %131 : vector<8x128xf32> to vector<8x128xbf16>
    %cst_32 = arith.constant dense<0.000000e+00> : vector<8x512xf32>
    %134 = tpu.matmul %133, %42, %cst_32 {dimension_numbers = #tpu.dot_dimension_numbers<[1], [0], [0], [1], [0, 0, 1, 1], [], []>} : vector<8x128xbf16>, vector<128x512xbf16>, vector<8x512xf32> -> vector<8x512xf32>
    %135 = arith.addf %132, %134 : vector<8x512xf32>
    %136 = vector.extract_strided_slice %135 {offsets = [0, 0], sizes = [8, 128], strides = [1, 1]} : vector<8x512xf32> to vector<8x128xf32>
    %137 = arith.negf %136 : vector<8x128xf32>
    %138 = math.exp %137 : vector<8x128xf32>
    %cst_33 = arith.constant 1.000000e+00 : f32
    %139 = vector.broadcast %cst_33 : f32 to vector<8x128xf32>
    %140 = arith.addf %139, %138 : vector<8x128xf32>
    %141 = arith.divf %139, %140 : vector<8x128xf32>
    %142 = vector.extract_strided_slice %135 {offsets = [0, 128], sizes = [8, 128], strides = [1, 1]} : vector<8x512xf32> to vector<8x128xf32>
    %143 = arith.negf %142 : vector<8x128xf32>
    %144 = math.exp %143 : vector<8x128xf32>
    %cst_34 = arith.constant 1.000000e+00 : f32
    %145 = vector.broadcast %cst_34 : f32 to vector<8x128xf32>
    %146 = arith.addf %145, %144 : vector<8x128xf32>
    %147 = arith.divf %145, %146 : vector<8x128xf32>
    %148 = vector.extract_strided_slice %135 {offsets = [0, 256], sizes = [8, 128], strides = [1, 1]} : vector<8x512xf32> to vector<8x128xf32>
    %149 = math.tanh %148 : vector<8x128xf32>
    %150 = vector.extract_strided_slice %135 {offsets = [0, 384], sizes = [8, 128], strides = [1, 1]} : vector<8x512xf32> to vector<8x128xf32>
    %151 = arith.negf %150 : vector<8x128xf32>
    %152 = math.exp %151 : vector<8x128xf32>
    %cst_35 = arith.constant 1.000000e+00 : f32
    %153 = vector.broadcast %cst_35 : f32 to vector<8x128xf32>
    %154 = arith.addf %153, %152 : vector<8x128xf32>
    %155 = arith.divf %153, %154 : vector<8x128xf32>
    %156 = arith.mulf %147, %129 : vector<8x128xf32>
    %157 = arith.mulf %141, %149 : vector<8x128xf32>
    %158 = arith.addf %156, %157 : vector<8x128xf32>
    %159 = math.tanh %158 : vector<8x128xf32>
    %160 = arith.mulf %155, %159 : vector<8x128xf32>
    %161 = vector.extract_strided_slice %41 {offsets = [0, 0], sizes = [8, 128], strides = [1, 1]} : vector<8x512xf32> to vector<8x128xf32>
    %162 = arith.negf %161 : vector<8x128xf32>
    %163 = math.exp %162 : vector<8x128xf32>
    %cst_36 = arith.constant 1.000000e+00 : f32
    %164 = vector.broadcast %cst_36 : f32 to vector<8x128xf32>
    %165 = arith.addf %164, %163 : vector<8x128xf32>
    %166 = arith.divf %164, %165 : vector<8x128xf32>
    %167 = vector.extract_strided_slice %41 {offsets = [0, 256], sizes = [8, 128], strides = [1, 1]} : vector<8x512xf32> to vector<8x128xf32>
    %168 = math.tanh %167 : vector<8x128xf32>
    %169 = vector.extract_strided_slice %41 {offsets = [0, 384], sizes = [8, 128], strides = [1, 1]} : vector<8x512xf32> to vector<8x128xf32>
    %170 = arith.negf %169 : vector<8x128xf32>
    %171 = math.exp %170 : vector<8x128xf32>
    %cst_37 = arith.constant 1.000000e+00 : f32
    %172 = vector.broadcast %cst_37 : f32 to vector<8x128xf32>
    %173 = arith.addf %172, %171 : vector<8x128xf32>
    %174 = arith.divf %172, %173 : vector<8x128xf32>
    %175 = arith.mulf %166, %168 : vector<8x128xf32>
    %176 = math.tanh %175 : vector<8x128xf32>
    %177 = arith.mulf %174, %176 : vector<8x128xf32>
    %178 = tpu.concatenate %160, %177 in 1 : vector<8x128xf32>, vector<8x128xf32> -> vector<8x256xf32>
    %179 = arith.truncf %178 : vector<8x256xf32> to vector<8x256xbf16>
    %c0_38 = arith.constant 0 : index
    %c0_39 = arith.constant 0 : index
    %180 = vector.load %arg9[%c0_38, %c0_39] : memref<256x256xbf16, #tpu.memory_space<vmem>>, vector<256x256xbf16>
    %cst_40 = arith.constant dense<0.000000e+00> : vector<8x256xf32>
    %181 = tpu.matmul %179, %180, %cst_40 {dimension_numbers = #tpu.dot_dimension_numbers<[1], [0], [0], [1], [0, 0, 1, 1], [], []>} : vector<8x256xbf16>, vector<256x256xbf16>, vector<8x256xf32> -> vector<8x256xf32>
    %c0_41 = arith.constant 0 : index
    %c0_42 = arith.constant 0 : index
    %182 = vector.load %arg10[%c0_41, %c0_42] : memref<1x256xf32, #tpu.memory_space<vmem>>, vector<1x256xf32>
    %183 = vector.broadcast %182 : vector<1x256xf32> to vector<8x256xf32>
    %184 = arith.addf %181, %183 : vector<8x256xf32>
    %c0_43 = arith.constant 0 : index
    %c0_44 = arith.constant 0 : index
    %185 = vector.load %arg11[%c0_43, %c0_44] : memref<8x256xf32, #tpu.memory_space<vmem>>, vector<8x256xf32>
    tpu.vector_store %arg11[%c0_43, %c0_44], %184 {strides = array<i32>} : memref<8x256xf32, #tpu.memory_space<vmem>>, vector<8x256xf32>,
    return
  }
  func.func @transform_0(%arg0: i32) -> (i32, i32) {
    %c0_i32 = arith.constant 0 : i32
    %c0_i32_0 = arith.constant 0 : i32
    return %arg0, %c0_i32 : i32, i32
  }
  func.func @transform_1(%arg0: i32) -> (i32, i32) {
    %c0_i32 = arith.constant 0 : i32
    %c0_i32_0 = arith.constant 0 : i32
    %c0_i32_1 = arith.constant 0 : i32
    return %c0_i32, %c0_i32_0 : i32, i32
  }
  func.func @transform_2(%arg0: i32) -> (i32, i32) {
    %c0_i32 = arith.constant 0 : i32
    %c0_i32_0 = arith.constant 0 : i32
    %c0_i32_1 = arith.constant 0 : i32
    return %c0_i32, %c0_i32_0 : i32, i32
  }
  func.func @transform_3(%arg0: i32) -> (i32, i32) {
    %c0_i32 = arith.constant 0 : i32
    %c0_i32_0 = arith.constant 0 : i32
    %c0_i32_1 = arith.constant 0 : i32
    return %c0_i32, %c0_i32_0 : i32, i32
  }
  func.func @transform_4(%arg0: i32) -> (i32, i32) {
    %c0_i32 = arith.constant 0 : i32
    %c0_i32_0 = arith.constant 0 : i32
    %c0_i32_1 = arith.constant 0 : i32
    return %c0_i32, %c0_i32_0 : i32, i32
  }
  func.func @transform_5(%arg0: i32) -> (i32, i32) {
    %c0_i32 = arith.constant 0 : i32
    %c0_i32_0 = arith.constant 0 : i32
    %c0_i32_1 = arith.constant 0 : i32
    return %c0_i32, %c0_i32_0 : i32, i32
  }
  func.func @transform_6(%arg0: i32) -> (i32, i32) {
    %c0_i32 = arith.constant 0 : i32
    %c0_i32_0 = arith.constant 0 : i32
    %c0_i32_1 = arith.constant 0 : i32
    return %c0_i32, %c0_i32_0 : i32, i32
  }
  func.func @transform_7(%arg0: i32) -> (i32, i32) {
    %c0_i32 = arith.constant 0 : i32
    %c0_i32_0 = arith.constant 0 : i32
    %c0_i32_1 = arith.constant 0 : i32
    return %c0_i32, %c0_i32_0 : i32, i32
  }
  func.func @transform_8(%arg0: i32) -> (i32, i32) {
    %c0_i32 = arith.constant 0 : i32
    %c0_i32_0 = arith.constant 0 : i32
    %c0_i32_1 = arith.constant 0 : i32
    return %c0_i32, %c0_i32_0 : i32, i32
  }
  func.func @transform_9(%arg0: i32) -> (i32, i32) {
    %c0_i32 = arith.constant 0 : i32
    %c0_i32_0 = arith.constant 0 : i32
    %c0_i32_1 = arith.constant 0 : i32
    return %c0_i32, %c0_i32_0 : i32, i32
  }
  func.func @transform_10(%arg0: i32) -> (i32, i32) {
    %c0_i32 = arith.constant 0 : i32
    %c0_i32_0 = arith.constant 0 : i32
    return %arg0, %c0_i32 : i32, i32
  }
}

</mosaic_0001>

<bundles_post_ra>
// kernel: cnn_lstm_forward.1
= control target key start
LH: loop header
LB: loop body
LE: loop exit
PB: predicated region body
PF: predicated region fallthrough
CT: control target
= control target key end

     0   :  { %15 = vsyncpa [#allocation3], 0  ;;  %s3273_s0 = inlined_call_operand.vmem [shape: f32[8,16], index: 0, kind: input, shape index: {}]   ;;  %s3274_s1 = inlined_call_operand.hbm [shape: bf16[16,1536], index: 1, kind: input, shape index: {}]   ;;  %s3275_s2 = inlined_call_operand.vmem [shape: f32[1,1536], index: 2, kind: input, shape index: {}]   ;;  %s3276_s3 = inlined_call_operand.hbm [shape: bf16[128,512], index: 3, kind: input, shape index: {}]   ;;  %s3277_s4 = inlined_call_operand.hbm [shape: f32[1,512], index: 4, kind: input, shape index: {}]   ;;  %s3278_s5 = inlined_call_operand.hbm [shape: bf16[128,512], index: 5, kind: input, shape index: {}]   ;;  %s3279_s6 = inlined_call_operand.vmem [shape: f32[1,512], index: 6, kind: input, shape index: {}]   ;;  %s3280_s7 = inlined_call_operand.hbm [shape: bf16[128,512], index: 7, kind: input, shape index: {}]   ;;  %s3281_s8 = inlined_call_operand.hbm [shape: bf16[256,256], index: 8, kind: input, shape index: {}]   ;;  %s3282_s9 = inlined_call_operand.vmem [shape: f32[1,256], index: 9, kind: input, shape index: {}]   ;;  %s3283_s10 = inlined_call_operand.vmem [shape: f32[8,256], index: 10, kind: output, shape index: {}]  }
   0x1   :  { %16 = vsyncpa [#allocation5], 0 }
   0x2   :  { %17 = vsyncpa [#allocation8], 0  ;;  %s40_s15 = sshll.u32 %s3276_s3, 4  ;;  %s41_s15 = int_to_ptr.hbm [resolvable:$true] %s40_s15 }
   0x3   :  { %18 = vsyncpa [#allocation11], 0  ;;  %s2813_s16 = smov [#allocation4]   ;;  %s64_s20 = sshll.u32 %s3278_s5, 4  ;;  %s65_s20 = int_to_ptr.hbm [resolvable:$true] %s64_s20 }
   0x4   :  { %s42_s17 = sshll.u32 %s2813_s16, 4  ;;  %s2814_s21 = smov 256   ;;  %s43_s17 = int_to_ptr.vmem [resolvable:$true] %s42_s17 }
   0x5   :  { %s2815_s22 = smov 16   ;;  %s2816_s23 = smov [#allocation7]  }
   0x6   :  { %48 = dma.hbm_to_vmem [thread:$0]  %s41_s15, 4096, %s43_s17, [#allocation5], %s2814_s21, %s2814_s21, %s2815_s22  }
   0x7   :  { %s66_s24 = sshll.u32 %s2816_s23, 4  ;;  %s25_s26 = sshll.u32 %s3274_s1, 4  ;;  %s67_s24 = int_to_ptr.vmem [resolvable:$true] %s66_s24  ;;  %s26_s26 = int_to_ptr.hbm [resolvable:$true] %s25_s26 }
   0x8   :  { %72 = dma.hbm_to_vmem [thread:$0]  %s65_s20, 4096, %s67_s24, [#allocation8], %s2814_s21, %s2814_s21, %s2815_s22  }
   0x9   :  { %s2817_s5 = smov [#allocation2]   ;;  %s54_s30 = sshll.u32 %s3277_s4, 4  ;;  %s55_s30 = int_to_ptr.hbm [resolvable:$true] %s54_s30 }
   0xa   :  { %s27_s27 = sshll.u32 %s2817_s5, 4  ;;  %s2818_s11 = smov 768   ;;  %s28_s27 = int_to_ptr.vmem [resolvable:$true] %s27_s27 }
   0xb   :  { %s2819_s12 = smov 48   ;;  %s2820_s13 = smov [#allocation6]  }
   0xc   :  { %33 = dma.hbm_to_vmem [thread:$0]  %s26_s26, 1536, %s28_s27, [#allocation3], %s2818_s11, %s2818_s11, %s2819_s12  }
   0xd   :  { %s56_s14 = sshll.u32 %s2820_s13, 4  ;;  %s79_s16 = sshll.u32 %s3280_s7, 4  ;;  %s57_s14 = int_to_ptr.vmem [resolvable:$true] %s56_s14  ;;  %s80_s16 = int_to_ptr.hbm [resolvable:$true] %s79_s16 }
   0xe   :  { %59 = dma.hbm_to_vmem [thread:$0]  %s55_s30, 64, %s57_s14, [#allocation5]  }
   0xf   :  { %s92_s19 = sshll.u32 %s3281_s8, 4  ;;  %s2821_s20 = smov [#allocation9]   ;;  %s93_s19 = int_to_ptr.hbm [resolvable:$true] %s92_s19 }
  0x10   :  { %s81_s23 = sshll.u32 %s2821_s20, 4  ;;  %s2822_s4 = smov [#allocation10]   ;;  %s82_s23 = int_to_ptr.vmem [resolvable:$true] %s81_s23 }
  0x11   :  { %87 = dma.hbm_to_vmem [thread:$0]  %s80_s16, 4096, %s82_s23, [#allocation8], %s2814_s21, %s2814_s21, %s2815_s22  }
  0x12   :  { %s94_s24 = sshll.u32 %s2822_s4, 4  ;;  %s2823_s25 = smov 128   ;;  %s95_s24 = int_to_ptr.vmem [resolvable:$true] %s94_s24 }
  0x13   :  { %s2824_s7 = smov 8  }
  0x14   :  { %100 = dma.hbm_to_vmem [thread:$0]  %s93_s19, 4096, %s95_s24, [#allocation11], %s2823_s25, %s2823_s25, %s2824_s7  }
  0x15   :  { %2805 = dma.done.wait [#allocation3], 1536  }
  0x16   :  { %2806 = vsyncadd [#allocation3], 4294965760 }
  0x17   :  { %2807 = dma.done.wait [#allocation5], 4160  }
  0x18   :  { %2808 = vsyncadd [#allocation5], 4294963136 }
  0x19   :  { %2809 = dma.done.wait [#allocation8], 8192  }
  0x1a   :  { %2810 = vsyncadd [#allocation8], 4294959104 }
  0x1b   :  { %2811 = dma.done.wait [#allocation11], 4096  }
  0x1c   :  { %2812 = vsyncadd [#allocation11], 4294963200  ;;  %v1888_v0 = vld [vmem:[#allocation2] sm:$0xf]  ;;  %v2446_v1 = vld [vmem:[#allocation2 + $0x2c] sm:$0xf0] }
  0x1d   :  { %v1896_v2 = vld [vmem:[#allocation2 + $0x8] sm:$0xf]  ;;  %v1889_v3 = vor.u32 %v2446_v1, %v1888_v0  ;;  %v2447_v4 = vld [vmem:[#allocation2 + $0x34] sm:$0xf0]  ;;  %v128_v5 = vld [vmem:[%s3273_s0] sm:$0xff]  ;;  %vm230_vm0 = vcmask 130048  }
  0x1e   :  { %v2441_v6 = vld [vmem:[#allocation2 + $0xc] sm:$0xf]  ;;  %v1897_v7 = vor.u32 %v2447_v4, %v1896_v2  ;;  %v129_v8 = vpack.c.bf16 %v128_v5, %v128_v5  ;;  %v1898_v9 = vld [vmem:[#allocation2 + $0x38] sm:$0xf0]  ;;  %v2440_v10 = vld [vmem:[#allocation2 + $0x4] sm:$0xf] }
  0x1f   :  { %v1890_v11 = vld [vmem:[#allocation2 + $0x30] sm:$0xf0]  ;;  %241 = vmatpush.bf16.msra.mxu3 %v1889_v3  ;;  %v1901_v12 = vor.u32 %v2441_v6, %v1898_v9  ;;  %v1912_v14 = vld [vmem:[#allocation2 + $0x18] sm:$0xf]  ;;  %v2449_v15 = vld [vmem:[#allocation2 + $0x44] sm:$0xf0] }
  0x20   :  { %v1893_v13 = vor.u32 %v2440_v10, %v1890_v11  ;;  %v2443_v16 = vld [vmem:[#allocation2 + $0x1c] sm:$0xf]  ;;  %267 = vmatpush.bf16.msra.mxu2 %v1897_v7  ;;  %v1913_v17 = vor.u32 %v2449_v15, %v1912_v14  ;;  %v1914_v18 = vld [vmem:[#allocation2 + $0x48] sm:$0xf0]  ;;  %v1904_v19 = vld [vmem:[#allocation2 + $0x10] sm:$0xf] }
  0x21   :  { %v2448_v20 = vld [vmem:[#allocation2 + $0x3c] sm:$0xf0]  ;;  %v1917_v21 = vor.u32 %v2443_v16, %v1914_v18  ;;  %v2442_v23 = vld [vmem:[#allocation2 + $0x14] sm:$0xf]  ;;  %v1906_v24 = vld [vmem:[#allocation2 + $0x40] sm:$0xf0] }
  0x22   :  { %254 = vmatpush.bf16.msra.mxu1 %v1893_v13  ;;  %v1905_v22 = vor.u32 %v2448_v20, %v1904_v19  ;;  %v1928_v25 = vld [vmem:[#allocation2 + $0x28] sm:$0xf]  ;;  %1934 = vmatmul.msk.bf16.vlgmr.msra.gmra.mxu3 %vm230_vm0, %v129_v8  ;;  %v1909_v26 = vor.u32 %v2442_v23, %v1906_v24  ;;  %v2451_v27 = vld [vmem:[#allocation2 + $0x54] sm:$0xf0]  ;;  %v2444_v29 = vld [vmem:[#allocation2 + $0x24] sm:$0xf] }
  0x23   :  { %280 = vmatpush.bf16.msrb.mxu3 %v1901_v12  ;;  %1936 = vmatmul.msk.bf16.vlgmr.msra.gmra.mxu2 %vm230_vm0, %v129_v8  ;;  %v1929_v28 = vor.u32 %v2451_v27, %v1928_v25  ;;  %v1922_v30 = vld [vmem:[#allocation2 + $0x50] sm:$0xf0]  ;;  %v1920_v31 = vld [vmem:[#allocation2 + $0x20] sm:$0xf]  ;;  %v2450_v33 = vld [vmem:[#allocation2 + $0x4c] sm:$0xf0] }
  0x24   :  { %319 = vmatpush.bf16.msrb.mxu2 %v1913_v17  ;;  %293 = vmatpush.bf16.msra.mxu0 %v1905_v22  ;;  %v1925_v32 = vor.u32 %v2444_v29, %v1922_v30  ;;  %v1921_v34 = vor.u32 %v2450_v33, %v1920_v31  ;;  %v2445_v35 = vld [vmem:[#allocation2 + $0x2c] sm:$0xf]  ;;  %v1930_v36 = vld [vmem:[#allocation2 + $0x58] sm:$0xf0]  ;;  %v2060_v38 = vld [vmem:[#allocation4 + $0xe0] sm:$0xf] }
  0x25   :  { %1935 = vmatmul.msk.bf16.vlgmr.msra.gmra.mxu1 %vm230_vm0, %v129_v8  ;;  %v1933_v37 = vor.u32 %v2445_v35, %v1930_v36  ;;  %v2482_v39 = vld [vmem:[#allocation4 + $0xec] sm:$0xf0]  ;;  %v2480_v40 = vld [vmem:[#allocation4 + $0xe4] sm:$0xf]  ;;  %v2062_v42 = vld [vmem:[#allocation4 + $0xf0] sm:$0xf0] }
  0x26   :  { %306 = vmatpush.bf16.msrb.mxu1 %v1909_v26  ;;  %v2061_v41 = vor.u32 %v2482_v39, %v2060_v38  ;;  %v2068_v43 = vld [vmem:[#allocation4 + $0xe8] sm:$0xf]  ;;  %v2483_v44 = vld [vmem:[#allocation4 + $0xf4] sm:$0xf0]  ;;  %v2065_v45 = vor.u32 %v2480_v40, %v2062_v42  ;;  %v2481_v47 = vld [vmem:[#allocation4 + $0xec] sm:$0xf] }
  0x27   :  { %332 = vmatpush.bf16.msra.mxu3 %v1917_v21  ;;  %1938 = vmatmul.msk.bf16.vlgmr.msra.gmra.mxu0 %vm230_vm0, %v129_v8  ;;  %v2069_v46 = vor.u32 %v2483_v44, %v2068_v43  ;;  %v2070_v48 = vld [vmem:[#allocation4 + $0xf8] sm:$0xf0]  ;;  %v2044_v50 = vld [vmem:[#allocation4 + $0xc0] sm:$0xf]  ;;  %v2478_v51 = vld [vmem:[#allocation4 + $0xcc] sm:$0xf0] }
  0x28   :  { %371 = vmatpush.bf16.msra.mxu2 %v1929_v28  ;;  %345 = vmatpush.bf16.msrb.mxu0 %v1921_v34  ;;  %v2073_v49 = vor.u32 %v2481_v47, %v2070_v48  ;;  %v2045_v52 = vor.u32 %v2478_v51, %v2044_v50  ;;  %v2476_v53 = vld [vmem:[#allocation4 + $0xc4] sm:$0xf]  ;;  %v2046_v54 = vld [vmem:[#allocation4 + $0xd0] sm:$0xf0]  ;;  %v2052_v55 = vld [vmem:[#allocation4 + $0xc8] sm:$0xf] }
  0x29   :  { %v2049_v56 = vor.u32 %v2476_v53, %v2046_v54  ;;  %v2479_v57 = vld [vmem:[#allocation4 + $0xd4] sm:$0xf0]  ;;  %v2477_v58 = vld [vmem:[#allocation4 + $0xcc] sm:$0xf]  ;;  %v2054_v59 = vld [vmem:[#allocation4 + $0xd8] sm:$0xf0] }
  0x2a   :  { %358 = vmatpush.bf16.msra.mxu1 %v1925_v32  ;;  %v2053_v60 = vor.u32 %v2479_v57, %v2052_v55  ;;  %v2057_v61 = vor.u32 %v2477_v58, %v2054_v59  ;;  %v2028_v62 = vld [vmem:[#allocation4 + $0xa0] sm:$0xf]  ;;  %v2474_v63 = vld [vmem:[#allocation4 + $0xac] sm:$0xf0]  ;;  %v2472_v0 = vld [vmem:[#allocation4 + $0xa4] sm:$0xf] }
  0x2b   :  { %v2029_v1 = vor.u32 %v2474_v63, %v2028_v62  ;;  %v2030_v2 = vld [vmem:[#allocation4 + $0xb0] sm:$0xf0]  ;;  %v2036_v3 = vld [vmem:[#allocation4 + $0xa8] sm:$0xf]  ;;  %v2475_v4 = vld [vmem:[#allocation4 + $0xb4] sm:$0xf0] }
  0x2c   :  { %628 = vmatpush.bf16.msra.mxu0 %v2061_v41  ;;  %v2033_v5 = vor.u32 %v2472_v0, %v2030_v2  ;;  %v2037_v6 = vor.u32 %v2475_v4, %v2036_v3  ;;  %v2473_v7 = vld [vmem:[#allocation4 + $0xac] sm:$0xf]  ;;  %v2012_v10 = vld [vmem:[#allocation4 + $0x80] sm:$0xf]  ;;  %v2470_v11 = vld [vmem:[#allocation4 + $0x8c] sm:$0xf0] }
  0x2d   :  { %v2468_v12 = vld [vmem:[#allocation4 + $0x84] sm:$0xf]  ;;  %v2013_v13 = vor.u32 %v2470_v11, %v2012_v10  ;;  %v2014_v14 = vld [vmem:[#allocation4 + $0x90] sm:$0xf0]  ;;  %v2020_v15 = vld [vmem:[#allocation4 + $0x88] sm:$0xf] }
  0x2e   :  { %v2471_v16 = vld [vmem:[#allocation4 + $0x94] sm:$0xf0]  ;;  %v2017_v17 = vor.u32 %v2468_v12, %v2014_v14  ;;  %v2469_v19 = vld [vmem:[#allocation4 + $0x8c] sm:$0xf]  ;;  %v2022_v20 = vld [vmem:[#allocation4 + $0x98] sm:$0xf0] }
  0x2f   :  { %v2021_v18 = vor.u32 %v2471_v16, %v2020_v15  ;;  %v2025_v21 = vor.u32 %v2469_v19, %v2022_v20  ;;  %v1996_v22 = vld [vmem:[#allocation4 + $0x60] sm:$0xf]  ;;  %v2466_v23 = vld [vmem:[#allocation4 + $0x6c] sm:$0xf0]  ;;  %v2464_v24 = vld [vmem:[#allocation4 + $0x64] sm:$0xf] }
  0x30   :  { %629 = vmatpush.bf16.msra.mxu0 %v2045_v52  ;;  %v1997_v25 = vor.u32 %v2466_v23, %v1996_v22  ;;  %v1998_v26 = vld [vmem:[#allocation4 + $0x70] sm:$0xf0]  ;;  %v2004_v27 = vld [vmem:[#allocation4 + $0x68] sm:$0xf]  ;;  %v2467_v28 = vld [vmem:[#allocation4 + $0x74] sm:$0xf0] }
  0x31   :  { %v2001_v29 = vor.u32 %v2464_v24, %v1998_v26  ;;  %v2005_v30 = vor.u32 %v2467_v28, %v2004_v27  ;;  %v2465_v31 = vld [vmem:[#allocation4 + $0x6c] sm:$0xf]  ;;  %v2006_v32 = vld [vmem:[#allocation4 + $0x78] sm:$0xf0]  ;;  %v1980_v34 = vld [vmem:[#allocation4 + $0x40] sm:$0xf] }
  0x32   :  { %1937 = vmatmul.msk.bf16.vlgmr.msrb.gmra.mxu3 %vm230_vm0, %v129_v8  ;;  %v2009_v33 = vor.u32 %v2465_v31, %v2006_v32  ;;  %v2462_v35 = vld [vmem:[#allocation4 + $0x4c] sm:$0xf0]  ;;  %v1982_v38 = vld [vmem:[#allocation4 + $0x50] sm:$0xf0]  ;;  %v1988_v39 = vld [vmem:[#allocation4 + $0x48] sm:$0xf] }
  0x33   :  { %1940 = vmatmul.msk.bf16.vlgmr.msrb.gmra.mxu2 %vm230_vm0, %v129_v8  ;;  %384 = vmatpush.bf16.msrb.mxu3 %v1933_v37  ;;  %v1981_v36 = vor.u32 %v2462_v35, %v1980_v34  ;;  %v2460_v37 = vld [vmem:[#allocation4 + $0x44] sm:$0xf]  ;;  %v2463_v41 = vld [vmem:[#allocation4 + $0x54] sm:$0xf0]  ;;  %v2461_v42 = vld [vmem:[#allocation4 + $0x4c] sm:$0xf] }
  0x34   :  { %666 = vmatpush.bf16.msrb.mxu2 %v2069_v46  ;;  %630 = vmatpush.bf16.msra.mxu0 %v2029_v1  ;;  %v1985_v40 = vor.u32 %v2460_v37, %v1982_v38  ;;  %v1990_v43 = vld [vmem:[#allocation4 + $0x58] sm:$0xf0]  ;;  %v1989_v44 = vor.u32 %v2463_v41, %v1988_v39  ;;  %v1964_v46 = vld [vmem:[#allocation4 + $0x20] sm:$0xf]  ;;  %v2458_v47 = vld [vmem:[#allocation4 + $0x2c] sm:$0xf0] }
  0x35   :  { %1939 = vmatmul.msk.bf16.vlgmr.msrb.gmra.mxu1 %vm230_vm0, %v129_v8  ;;  %v2456_v48 = vld [vmem:[#allocation4 + $0x24] sm:$0xf]  ;;  %v1966_v50 = vld [vmem:[#allocation4 + $0x30] sm:$0xf0]  ;;  %v1972_v51 = vld [vmem:[#allocation4 + $0x28] sm:$0xf] }
  0x36   :  { %647 = vmatpush.bf16.msrb.mxu1 %v2065_v45  ;;  %v1993_v45 = vor.u32 %v2461_v42, %v1990_v43  ;;  %v2459_v52 = vld [vmem:[#allocation4 + $0x34] sm:$0xf0]  ;;  %v1969_v53 = vor.u32 %v2456_v48, %v1966_v50  ;;  %v2457_v55 = vld [vmem:[#allocation4 + $0x2c] sm:$0xf]  ;;  %v1948_v58 = vld [vmem:[#allocation4] sm:$0xf] }
  0x37   :  { %1942 = vmatmul.msk.bf16.vlgmr.msrb.gmra.mxu0 %vm230_vm0, %v129_v8  ;;  %v1973_v54 = vor.u32 %v2459_v52, %v1972_v51  ;;  %v2454_v59 = vld [vmem:[#allocation4 + $0xc] sm:$0xf0]  ;;  %v1950_v62 = vld [vmem:[#allocation4 + $0x10] sm:$0xf0]  ;;  %v1956_v63 = vld [vmem:[#allocation4 + $0x8] sm:$0xf] }
  0x38   :  { %667 = vmatpush.bf16.msrb.mxu2 %v2053_v60  ;;  %631 = vmatpush.bf16.msra.mxu0 %v2013_v13  ;;  %v2452_v60 = vld [vmem:[#allocation4 + $0x4] sm:$0xf]  ;;  %v2455_v0 = vld [vmem:[#allocation4 + $0x14] sm:$0xf0]  ;;  %v2453_v3 = vld [vmem:[#allocation4 + $0xc] sm:$0xf] }
  0x39   :  { %v1953_v1 = vor.u32 %v2452_v60, %v1950_v62  ;;  %v1957_v2 = vor.u32 %v2455_v0, %v1956_v63  ;;  %v1958_v4 = vld [vmem:[#allocation4 + $0x18] sm:$0xf0]  ;;  %v2926_v10 = vld [vmem:[%s3275_s2] sm:$0xff]  ;;  %v2164_v13 = vld [vmem:[#allocation7 + $0xe8] sm:$0xf] }
  0x3a   :  { %648 = vmatpush.bf16.msrb.mxu1 %v2049_v56  ;;  %v1974_v56 = vld [vmem:[#allocation4 + $0x38] sm:$0xf0]  ;;  %v146_v20 = vperm.slane %v2926_v10, 0  ;;  %v2148_v22 = vld [vmem:[#allocation7 + $0xc0] sm:$0xf]  ;;  %v148_v31 = vperm.slane %v2926_v10, 2 }
  0x3b   :  { %v1977_v57 = vor.u32 %v2457_v55, %v1974_v56  ;;  %v2507_v14 = vld [vmem:[#allocation7 + $0xf4] sm:$0xf0]  ;;  %v2503_v23 = vld [vmem:[#allocation7 + $0xcc] sm:$0xf0]  ;;  %v2152_v26 = vld [vmem:[#allocation7 + $0xc8] sm:$0xf] }
  0x3c   :  { %668 = vmatpush.bf16.msrb.mxu2 %v2037_v6  ;;  %632 = vmatpush.bf16.msra.mxu0 %v1997_v25  ;;  %v1961_v6 = vor.u32 %v2453_v3, %v1958_v4  ;;  %v2165_v16 = vor.u32 %v2507_v14, %v2164_v13  ;;  %v2149_v25 = vor.u32 %v2503_v23, %v2148_v22  ;;  %v2504_v27 = vld [vmem:[#allocation7 + $0xd4] sm:$0xf0]  ;;  %v150_v32 = vperm.slane %v2926_v10, 4  ;;  %v2136_v37 = vld [vmem:[#allocation7 + $0xa0] sm:$0xf] }
  0x3d   :  { %v2153_v28 = vor.u32 %v2504_v27, %v2152_v26  ;;  %v2500_v38 = vld [vmem:[#allocation7 + $0xac] sm:$0xf0]  ;;  %v2140_v39 = vld [vmem:[#allocation7 + $0xa8] sm:$0xf]  ;;  %v2501_v42 = vld [vmem:[#allocation7 + $0xb4] sm:$0xf0] }
  0x3e   :  { %649 = vmatpush.bf16.msrb.mxu1 %v2033_v5  ;;  %v2137_v41 = vor.u32 %v2500_v38, %v2136_v37  ;;  %v2499_v43 = vld [vmem:[#allocation7 + $0xac] sm:$0xf]  ;;  %v149_v48 = vperm.slane %v2926_v10, 3  ;;  %v2497_v55 = vld [vmem:[#allocation7 + $0x8c] sm:$0xf0] }
  0x3f   :  { %v2496_v60 = vld [vmem:[#allocation7 + $0x8c] sm:$0xf]  ;;  %v2130_v62 = vld [vmem:[#allocation7 + $0x98] sm:$0xf0]  ;;  %v2284_v63 = vld [vmem:[#allocation9 + $0xe0] sm:$0xf] }
  0x40   :  { %669 = vmatpush.bf16.msrb.mxu2 %v2021_v18  ;;  %633 = vmatpush.bf16.msra.mxu0 %v1981_v36  ;;  %v2166_v18 = vld [vmem:[#allocation7 + $0xf8] sm:$0xf0]  ;;  %v2538_v0 = vld [vmem:[#allocation9 + $0xec] sm:$0xf0]  ;;  %v2116_v13 = vld [vmem:[#allocation7 + $0x68] sm:$0xf] }
  0x41   :  { %v2495_v14 = vld [vmem:[#allocation7 + $0x74] sm:$0xf0]  ;;  %v2100_v27 = vld [vmem:[#allocation7 + $0x40] sm:$0xf] }
  0x42   :  { %1941 = vmatmul.msk.bf16.vlgmr.msra.gmra.mxu3 %vm230_vm0, %v129_v8  ;;  %650 = vmatpush.bf16.msrb.mxu1 %v2017_v17  ;;  %v2505_v17 = vld [vmem:[#allocation7 + $0xec] sm:$0xf]  ;;  %v2252_v37 = vld [vmem:[#allocation9 + $0xa0] sm:$0xf] }
  0x43   :  { %1944 = vmatmul.msk.bf16.vlgmr.msra.gmra.mxu2 %vm230_vm0, %v129_v8  ;;  %685 = vmatpush.bf16.msra.mxu3 %v2073_v49  ;;  %v1965_v49 = vor.u32 %v2458_v47, %v1964_v46  ;;  %v2169_v19 = vor.u32 %v2505_v17, %v2166_v18  ;;  %v2141_v46 = vor.u32 %v2501_v42, %v2140_v39  ;;  %v2530_v39 = vld [vmem:[#allocation9 + $0xac] sm:$0xf0] }
  0x44   :  { %670 = vmatpush.bf16.msrb.mxu2 %v2005_v30  ;;  %v2154_v30 = vld [vmem:[#allocation7 + $0xd8] sm:$0xf0]  ;;  %v2117_v18 = vor.u32 %v2495_v14, %v2116_v13  ;;  %v2522_v13 = vld [vmem:[#allocation9 + $0x6c] sm:$0xf0]  ;;  %v2536_v14 = vld [vmem:[#allocation9 + $0xe4] sm:$0xf] }
  0x45   :  { %1943 = vmatmul.msk.bf16.vlgmr.msra.gmra.mxu1 %vm230_vm0, %v129_v8  ;;  %634 = vmatpush.bf16.msra.mxu0 %v1965_v49  ;;  %v151_v49 = vperm.slane %v2926_v10, 5 }
  0x46   :  { %651 = vmatpush.bf16.msrb.mxu1 %v2001_v29  ;;  %v2502_v29 = vld [vmem:[#allocation7 + $0xcc] sm:$0xf] }
  0x47   :  { %686 = vmatpush.bf16.msra.mxu3 %v2057_v61  ;;  %v1949_v61 = vor.u32 %v2454_v59, %v1948_v58  ;;  %v2128_v58 = vld [vmem:[#allocation7 + $0x88] sm:$0xf]  ;;  %v2498_v59 = vld [vmem:[#allocation7 + $0x94] sm:$0xf0] }
  0x48   :  { %671 = vmatpush.bf16.msrb.mxu2 %v1989_v44  ;;  %v2142_v44 = vld [vmem:[#allocation7 + $0xb8] sm:$0xf0] }
  0x49   :  { %635 = vmatpush.bf16.msra.mxu0 %v1949_v61  ;;  %v2145_v47 = vor.u32 %v2499_v43, %v2142_v44  ;;  %v2129_v61 = vor.u32 %v2498_v59, %v2128_v58  ;;  %v2944_v43 = vor.u32 %v2530_v39, %v2252_v37  ;;  %v2088_v44 = vld [vmem:[#allocation7 + $0x20] sm:$0xf]  ;;  %v153_v58 = vperm.slane %v2926_v10, 7  ;;  %v2533_v39 = vld [vmem:[#allocation9 + $0xcc] sm:$0xf] }
  0x4a   :  { %652 = vmatpush.bf16.msrb.mxu1 %v1985_v40 }
  0x4c   :  { %672 = vmatpush.bf16.msrb.mxu2 %v1973_v54  ;;  %v2124_v54 = vld [vmem:[#allocation7 + $0x80] sm:$0xf] }
  0x4e   :  { %653 = vmatpush.bf16.msrb.mxu1 %v1969_v53 }
  0x50   :  { %673 = vmatpush.bf16.msrb.mxu2 %v1957_v2  ;;  %v2934_v2 = vor.u32 %v2538_v0, %v2284_v63  ;;  %v2485_v63 = vld [vmem:[#allocation7 + $0xc] sm:$0xf0]  ;;  %v2080_v0 = vld [vmem:[#allocation7 + $0x8] sm:$0xf] }
  0x52   :  { %1945 = vmatmul.msk.bf16.vlgmr.msrb.gmra.mxu3 %vm230_vm0, %v129_v8  ;;  %v2038_v8 = vld [vmem:[#allocation4 + $0xb8] sm:$0xf0]  ;;  %654 = vmatpush.bf16.msrb.mxu1 %v1953_v1  ;;  %v2133_v1 = vor.u32 %v2496_v60, %v2130_v62  ;;  %v2076_v62 = vld [vmem:[#allocation7] sm:$0xf] }
  0x53   :  { %v2041_v9 = vor.u32 %v2473_v7, %v2038_v8  ;;  %v2160_v8 = vld [vmem:[#allocation7 + $0xe0] sm:$0xf] }
  0x54   :  { %898 = vmatpush.bf16.msra.mxu2 %v2169_v19  ;;  %v2118_v19 = vld [vmem:[#allocation7 + $0x78] sm:$0xf0] }
  0x55   :  { %687 = vmatpush.bf16.msra.mxu3 %v2041_v9  ;;  %v2506_v9 = vld [vmem:[#allocation7 + $0xec] sm:$0xf0] }
  0x56   :  { %v2161_v12 = vor.u32 %v2506_v9, %v2160_v8  ;;  %885 = vmatpush.bf16.msra.mxu1 %v2165_v16  ;;  %v2112_v8 = vld [vmem:[#allocation7 + $0x60] sm:$0xf]  ;;  %v2494_v9 = vld [vmem:[#allocation7 + $0x6c] sm:$0xf0] }
  0x58   :  { %872 = vmatpush.bf16.msrb.mxu0 %v2161_v12  ;;  %v2113_v12 = vor.u32 %v2494_v9, %v2112_v8 }
  0x59   :  { %688 = vmatpush.bf16.msra.mxu3 %v2025_v21  ;;  %v147_v21 = vperm.slane %v2926_v10, 1 }
  0x5a   :  { %886 = vmatpush.bf16.msra.mxu1 %v2153_v28  ;;  %v2491_v28 = vld [vmem:[#allocation7 + $0x4c] sm:$0xf0] }
  0x5c   :  { %873 = vmatpush.bf16.msrb.mxu0 %v2149_v25 }
  0x5d   :  { %689 = vmatpush.bf16.msra.mxu3 %v2009_v33  ;;  %v2157_v33 = vor.u32 %v2502_v29, %v2154_v30  ;;  %v2101_v30 = vor.u32 %v2491_v28, %v2100_v27  ;;  %v2204_v28 = vld [vmem:[#allocation9 + $0x40] sm:$0xf] }
  0x5e   :  { %887 = vmatpush.bf16.msra.mxu1 %v2141_v46  ;;  %v2092_v46 = vld [vmem:[#allocation7 + $0x28] sm:$0xf] }
  0x5f   :  { %899 = vmatpush.bf16.msra.mxu2 %v2157_v33 }
  0x60   :  { %874 = vmatpush.bf16.msrb.mxu0 %v2137_v41 }
  0x61   :  { %690 = vmatpush.bf16.msra.mxu3 %v1993_v45 }
  0x62   :  { %888 = vmatpush.bf16.msra.mxu1 %v2129_v61 }
  0x63   :  { %900 = vmatpush.bf16.msra.mxu2 %v2145_v47 }
  0x65   :  { %691 = vmatpush.bf16.msra.mxu3 %v1977_v57  ;;  %v2125_v57 = vor.u32 %v2497_v55, %v2124_v54 }
  0x66   :  { %889 = vmatpush.bf16.msra.mxu1 %v2117_v18  ;;  %v2292_v18 = vld [vmem:[#allocation9 + $0xe8] sm:$0xf] }
  0x67   :  { %875 = vmatpush.bf16.msrb.mxu0 %v2125_v57  ;;  %901 = vmatpush.bf16.msra.mxu2 %v2133_v1  ;;  %v2526_v57 = vld [vmem:[#allocation9 + $0x8c] sm:$0xf0] }
  0x69   :  { %692 = vmatpush.bf16.msra.mxu3 %v1961_v6 }
  0x6b   :  { %876 = vmatpush.bf16.msrb.mxu0 %v2113_v12  ;;  %v2220_v12 = vld [vmem:[#allocation9 + $0x60] sm:$0xf] }
  0x6d   :  { %1103 = vmatpush.bf16.msrb.mxu3 %v2934_v2 }
  0x6f   :  { %877 = vmatpush.bf16.msrb.mxu0 %v2101_v30  ;;  %v2532_v30 = vld [vmem:[#allocation9 + $0xc4] sm:$0xf] }
  0xa2   :  { %v256_v5 = vpop.f32.mrf.mxu1 }
  0xa3   :  { %v257_v35 = vadd.f32 %v256_v5, %v147_v21  ;;  %v2534_v21 = vld [vmem:[#allocation9 + $0xcc] sm:$0xf0] }
  0xa4   :  { %v295_v7 = vpop.f32.mrf.mxu0 }
  0xa5   :  { %v243_v11 = vpop.f32.mrf.mxu3  ;;  %v391_v51 = vmax.f32 %v257_v35, 0.0  ;;  %v296_v53 = vadd.f32 %v295_v7, %v150_v32  ;;  %v2492_v32 = vld [vmem:[#allocation7 + $0x54] sm:$0xf0]  ;;  %v2490_v35 = vld [vmem:[#allocation7 + $0x4c] sm:$0xf] }
  0xa6   :  { %v269_v15 = vpop.f32.mrf.mxu2  ;;  %v244_v34 = vadd.f32 %v243_v11, %v146_v20  ;;  %v2268_v20 = vld [vmem:[#allocation9 + $0xc0] sm:$0xf] }
  0xa7   :  { %v270_v52 = vadd.f32 %v269_v15, %v148_v31  ;;  %v394_v5 = vmax.f32 %v296_v53, 0.0  ;;  %v2493_v15 = vld [vmem:[#allocation7 + $0x6c] sm:$0xf]  ;;  %v2941_v23 = vor.u32 %v2534_v21, %v2268_v20  ;;  %v2104_v31 = vld [vmem:[#allocation7 + $0x48] sm:$0xf] }
  0xa8   :  { %v390_v50 = vmax.f32 %v244_v34, 0.0  ;;  %v2121_v22 = vor.u32 %v2493_v15, %v2118_v19  ;;  %v2105_v34 = vor.u32 %v2492_v32, %v2104_v31  ;;  %v2953_v15 = vor.u32 %v2522_v13, %v2220_v12  ;;  %v2539_v19 = vld [vmem:[#allocation9 + $0xf4] sm:$0xf0]  ;;  %v2958_v20 = vld [vmem:[%s3275_s2 + $0x8] sm:$0xf] }
  0xa9   :  { %v392_v4 = vmax.f32 %v270_v52, 0.0  ;;  %1104 = vmatpush.bf16.msrb.mxu3 %v2941_v23  ;;  %v2270_v32 = vld [vmem:[#allocation9 + $0xd0] sm:$0xf0]  ;;  %v157_v13 = vperm.slane %v2958_v20, 3 }
  0xaa   :  { %v258_v24 = vpop.f32.mrf.mxu1  ;;  %v402_v3 = vmax.f32 %v390_v50, %v391_v51  ;;  %902 = vmatpush.bf16.msra.mxu2 %v2121_v22  ;;  %890 = vmatpush.bf16.msra.mxu1 %v2105_v34  ;;  %v2487_v50 = vld [vmem:[#allocation7 + $0x2c] sm:$0xf]  ;;  %v2094_v51 = vld [vmem:[#allocation7 + $0x38] sm:$0xf0]  ;;  %v2962_v22 = vor.u32 %v2539_v19, %v2292_v18  ;;  %v2535_v34 = vld [vmem:[#allocation9 + $0xd4] sm:$0xf0] }
  0xab   :  { %v2097_v55 = vor.u32 %v2487_v50, %v2094_v51  ;;  %v2254_v50 = vld [vmem:[#allocation9 + $0xb0] sm:$0xf0]  ;;  %v2260_v51 = vld [vmem:[#allocation9 + $0xa8] sm:$0xf] }
  0xac   :  { %v297_v36 = vpop.f32.mrf.mxu0  ;;  %v403_v24 = vmax.f32 %v402_v3, %v392_v4  ;;  %v2077_v3 = vor.u32 %v2485_v63, %v2076_v62  ;;  %v2486_v4 = vld [vmem:[#allocation7 + $0x14] sm:$0xf0]  ;;  %v2510_v62 = vld [vmem:[#allocation9 + $0xc] sm:$0xf0] }
  0xad   :  { %v245_v40 = vpop.f32.mrf.mxu3  ;;  %v2106_v36 = vld [vmem:[#allocation7 + $0x58] sm:$0xf0]  ;;  %1105 = vmatpush.bf16.msrb.mxu3 %v2944_v43  ;;  %v2081_v9 = vor.u32 %v2486_v4, %v2080_v0  ;;  %v2238_v0 = vld [vmem:[#allocation9 + $0x90] sm:$0xf0] }
  0xae   :  { %v271_v45 = vpop.f32.mrf.mxu2  ;;  %v2109_v38 = vor.u32 %v2490_v35, %v2106_v36  ;;  %v410_v40 = vpack.c.bf16 %v403_v24, %v403_v24  ;;  %v2537_v24 = vld [vmem:[#allocation9 + $0xec] sm:$0xf]  ;;  %v152_v35 = vperm.slane %v2926_v10, 6  ;;  %v154_v36 = vperm.slane %v2958_v20, 0 }
  0xaf   :  { %v2488_v45 = vld [vmem:[#allocation7 + $0x2c] sm:$0xf0] }
  0xb0   :  { %903 = vmatpush.bf16.msra.mxu2 %v2109_v38  ;;  %v460_v60 = vunpack.c.l.b16 %v410_v40  ;;  %v2972_v38 = vor.u32 %v2532_v30, %v2270_v32  ;;  %v2278_v40 = vld [vmem:[#allocation9 + $0xd8] sm:$0xf0]  ;;  %v2521_v32 = vld [vmem:[#allocation9 + $0x6c] sm:$0xf] }
  0xb2   :  { %v308_v56 = vpop.f32.mrf.mxu1 }
  0xb3   :  { %v309_v6 = vadd.f32 %v308_v56, %v151_v49  ;;  %v2489_v49 = vld [vmem:[#allocation7 + $0x34] sm:$0xf0]  ;;  %v2236_v56 = vld [vmem:[#allocation9 + $0x80] sm:$0xf] }
  0xb4   :  { %v2936_v7 = vpop.f32.mrf.mxu0  ;;  %v2093_v54 = vor.u32 %v2489_v49, %v2092_v46  ;;  %v2948_v59 = vor.u32 %v2526_v57, %v2236_v56  ;;  %904 = vmatpush.bf16.msra.mxu2 %v2097_v55  ;;  %v2528_v46 = vld [vmem:[#allocation9 + $0xa4] sm:$0xf]  ;;  %v2262_v55 = vld [vmem:[#allocation9 + $0xb8] sm:$0xf0] }
  0xb5   :  { %v282_v11 = vpop.f32.mrf.mxu3  ;;  %v395_v26 = vmax.f32 %v309_v6, 0.0  ;;  %v2082_v6 = vld [vmem:[#allocation7 + $0x18] sm:$0xf0]  ;;  %v348_v56 = vadd.f32 %v2936_v7, %v154_v36  ;;  %v2524_v7 = vld [vmem:[#allocation9 + $0x84] sm:$0xf] }
  0xb6   :  { %v283_v16 = vadd.f32 %v282_v11, %v149_v48  ;;  %v2939_v17 = vpop.f32.mrf.mxu2  ;;  %v2089_v48 = vor.u32 %v2488_v45, %v2088_v44  ;;  %891 = vmatpush.bf16.msra.mxu1 %v2093_v54  ;;  %1106 = vmatpush.bf16.msrb.mxu3 %v2948_v59  ;;  %v2188_v44 = vld [vmem:[#allocation9 + $0x20] sm:$0xf]  ;;  %v2514_v45 = vld [vmem:[#allocation9 + $0x2c] sm:$0xf0]  ;;  %v2529_v54 = vld [vmem:[#allocation9 + $0xac] sm:$0xf] }
  0xb7   :  { %v2987_v57 = vor.u32 %v2514_v45, %v2188_v44  ;;  %v322_v63 = vadd.f32 %v2939_v17, %v152_v35  ;;  %v398_v19 = vmax.f32 %v348_v56, 0.0  ;;  %v2212_v44 = vld [vmem:[#allocation9 + $0x48] sm:$0xf] }
  0xb8   :  { %v393_v25 = vmax.f32 %v283_v16, 0.0  ;;  %878 = vmatpush.bf16.msrb.mxu0 %v2089_v48  ;;  %v2286_v16 = vld [vmem:[#allocation9 + $0xf0] sm:$0xf0]  ;;  %v156_v48 = vperm.slane %v2958_v20, 2 }
  0xb9   :  { %v2960_v21 = vor.u32 %v2536_v14, %v2286_v16  ;;  %v3004_v16 = vor.u32 %v2524_v7, %v2238_v0  ;;  %v396_v18 = vmax.f32 %v322_v63, 0.0  ;;  %v2515_v63 = vld [vmem:[#allocation9 + $0x34] sm:$0xf0]  ;;  %v2513_v7 = vld [vmem:[#allocation9 + $0x2c] sm:$0xf] }
  0xba   :  { %v310_v29 = vpop.f32.mrf.mxu1  ;;  %v404_v33 = vmax.f32 %v393_v25, %v394_v5  ;;  %v2484_v5 = vld [vmem:[#allocation7 + $0xc] sm:$0xf]  ;;  %v2294_v25 = vld [vmem:[#allocation9 + $0xf8] sm:$0xf0]  ;;  %892 = vmatpush.bf16.msra.mxu1 %v2081_v9  ;;  %1107 = vmatpush.bf16.msrb.mxu3 %v2953_v15 }
  0xbb   :  { %v2085_v11 = vor.u32 %v2484_v5, %v2082_v6  ;;  %v2964_v27 = vor.u32 %v2537_v24, %v2294_v25  ;;  %v2518_v29 = vld [vmem:[#allocation9 + $0x4c] sm:$0xf0]  ;;  %v2527_v5 = vld [vmem:[#allocation9 + $0x94] sm:$0xf0]  ;;  %v2525_v6 = vld [vmem:[#allocation9 + $0x8c] sm:$0xf] }
  0xbc   :  { %v405_v41 = vmax.f32 %v404_v33, %v395_v26  ;;  %v349_v42 = vpop.f32.mrf.mxu0  ;;  %879 = vmatpush.bf16.msrb.mxu0 %v2077_v3  ;;  %v2276_v33 = vld [vmem:[#allocation9 + $0xc8] sm:$0xf]  ;;  %v2970_v37 = vor.u32 %v2518_v29, %v2204_v28  ;;  %v2520_v25 = vld [vmem:[#allocation9 + $0x64] sm:$0xf]  ;;  %v2198_v0 = vld [vmem:[#allocation9 + $0x38] sm:$0xf0] }
  0xbd   :  { %v284_v47 = vpop.f32.mrf.mxu3  ;;  %905 = vmatpush.bf16.msra.mxu2 %v2085_v11  ;;  %v2978_v42 = vor.u32 %v2533_v39, %v2278_v40  ;;  %v2244_v3 = vld [vmem:[#allocation9 + $0x88] sm:$0xf]  ;;  %v2516_v39 = vld [vmem:[#allocation9 + $0x44] sm:$0xf]  ;;  %v2206_v40 = vld [vmem:[#allocation9 + $0x50] sm:$0xf0] }
  0xbe   :  { %v411_v52 = vpack.c.bf16 %v405_v41, %v405_v41  ;;  %v323_v53 = vpop.f32.mrf.mxu2  ;;  %v2976_v41 = vor.u32 %v2535_v34, %v2276_v33  ;;  %v155_v47 = vperm.slane %v2958_v20, 1  ;;  %1108 = vmatpush.bf16.msrb.mxu3 %v2970_v37  ;;  %v3008_v24 = vor.u32 %v2527_v5, %v2244_v3  ;;  %v2222_v20 = vld [vmem:[#allocation9 + $0x70] sm:$0xf0]  ;;  %v2230_v34 = vld [vmem:[#allocation9 + $0x78] sm:$0xf0] }
  0xbf   :  { %v2531_v53 = vld [vmem:[#allocation9 + $0xb4] sm:$0xf0]  ;;  %v3014_v33 = vor.u32 %v2520_v25, %v2222_v20  ;;  %v3020_v36 = vor.u32 %v2521_v32, %v2230_v34  ;;  %v2509_v20 = vld [vmem:[#allocation9 + $0xc] sm:$0xf]  ;;  %v2825_v32 = vmov 0  }
  0xc0   :  { %v461_v61 = vunpack.c.l.b16 %v411_v52  ;;  %v2994_v10 = vor.u32 %v2531_v53, %v2260_v51  ;;  %v2512_v53 = vld [vmem:[#allocation9 + $0x24] sm:$0xf] }
  0xc2   :  { %v2950_v1 = vpop.f32.mrf.mxu1  ;;  %v464_v8 = vpack.c.b16 %v461_v61, %v460_v60  ;;  %v2989_v60 = vor.u32 %v2528_v46, %v2254_v50  ;;  %v2172_v61 = vld [vmem:[#allocation9] sm:$0xf]  ;;  %1109 = vmatpush.bf16.msrb.mxu3 %v2987_v57  ;;  %v2519_v46 = vld [vmem:[#allocation9 + $0x54] sm:$0xf0] }
  0xc3   :  { %v361_v11 = vadd.f32 %v2950_v1, %v155_v47  ;;  %v3002_v14 = vor.u32 %v2510_v62, %v2172_v61  ;;  %v2517_v47 = vld [vmem:[#allocation9 + $0x4c] sm:$0xf]  ;;  %v2190_v61 = vld [vmem:[#allocation9 + $0x30] sm:$0xf0]  ;;  %v2196_v62 = vld [vmem:[#allocation9 + $0x28] sm:$0xf] }
  0xc4   :  { %636 = vmatmul.bf16.vlgmr.msra.gmra.mxu0 %v464_v8  ;;  %655 = vmatmul.bf16.vlgmr.msrb.gmra.mxu1 %v464_v8  ;;  %v3034_v5 = vor.u32 %v2512_v53, %v2190_v61 }
  0xc5   :  { %674 = vmatmul.bf16.vlgmr.msrb.gmra.mxu2 %v464_v8  ;;  %693 = vmatmul.bf16.vlgmr.msra.gmra.mxu3 %v464_v8  ;;  %v334_v26 = vpop.f32.mrf.mxu3  ;;  %v2246_v8 = vld [vmem:[#allocation9 + $0x98] sm:$0xf0]  ;;  %v399_v29 = vmax.f32 %v361_v11, 0.0  ;;  %v2508_v11 = vld [vmem:[#allocation9 + $0x4] sm:$0xf] }
  0xc6   :  { %v373_v31 = vpop.f32.mrf.mxu2  ;;  %1116 = vmatpush.bf16.msra.mxu0 %v2960_v21  ;;  %1129 = vmatpush.bf16.msrb.mxu1 %v2962_v22  ;;  %v335_v52 = vadd.f32 %v334_v26, %v153_v58  ;;  %v2996_v58 = vor.u32 %v2529_v54, %v2262_v55  ;;  %v3010_v1 = vor.u32 %v2525_v6, %v2246_v8  ;;  %v2228_v26 = vld [vmem:[#allocation9 + $0x68] sm:$0xf] }
  0xc7   :  { %1142 = vmatpush.bf16.msrb.mxu2 %v2964_v27  ;;  %v374_v12 = vadd.f32 %v373_v31, %v156_v48  ;;  %v2523_v31 = vld [vmem:[#allocation9 + $0x74] sm:$0xf0]  ;;  %1110 = vmatpush.bf16.msrb.mxu3 %v3002_v14  ;;  %v2214_v48 = vld [vmem:[#allocation9 + $0x58] sm:$0xf0]  ;;  %v3028_v55 = vor.u32 %v2519_v46, %v2212_v44  ;;  %v3038_v8 = vor.u32 %v2515_v63, %v2196_v62 }
  0xc8   :  { %v397_v9 = vmax.f32 %v335_v52, 0.0  ;;  %v3018_v35 = vor.u32 %v2523_v31, %v2228_v26  ;;  %v3024_v52 = vor.u32 %v2516_v39, %v2206_v40  ;;  %v3030_v56 = vor.u32 %v2517_v47, %v2214_v48  ;;  %v2182_v26 = vld [vmem:[#allocation9 + $0x18] sm:$0xf0] }
  0xc9   :  { %v400_v30 = vmax.f32 %v374_v12, 0.0  ;;  %v3050_v31 = vor.u32 %v2509_v20, %v2182_v26  ;;  %v446_v40 = vld [vmem:[#allocation6] sm:$0xf] }
  0xca   :  { %v362_v49 = vpop.f32.mrf.mxu1  ;;  %1117 = vmatpush.bf16.msra.mxu0 %v2972_v38  ;;  %1130 = vmatpush.bf16.msrb.mxu1 %v2976_v41  ;;  %v406_v28 = vmax.f32 %v396_v18, %v397_v9  ;;  %v3040_v9 = vor.u32 %v2513_v7, %v2198_v0  ;;  %v2511_v18 = vld [vmem:[#allocation9 + $0x14] sm:$0xf0]  ;;  %v448_v44 = vperm.slane %v446_v40, 0  ;;  %v3124_v53 = vperm.slane %v446_v40, 2  ;;  %v736_v26 = vld [vmem:[%s3279_s6] sm:$0xf] }
  0xcb   :  { %1143 = vmatpush.bf16.msrb.mxu2 %v2978_v42  ;;  %1223 = vmatpush.bf16.msra.mxu3 %v2934_v2  ;;  %v408_v50 = vmax.f32 %v399_v29, %v400_v30 }
  0xcc   :  { %v407_v49 = vmax.f32 %v406_v28, %v398_v19 }
  0xcd   :  { %v336_v4 = vpop.f32.mrf.mxu3 }
  0xce   :  { %v375_v17 = vpop.f32.mrf.mxu2  ;;  %1118 = vmatpush.bf16.msra.mxu0 %v2989_v60  ;;  %1131 = vmatpush.bf16.msrb.mxu1 %v2994_v10  ;;  %v412_v3 = vpack.c.bf16 %v407_v49, %v407_v49 }
  0xcf   :  { %1144 = vmatpush.bf16.msrb.mxu2 %v2996_v58  ;;  %1224 = vmatpush.bf16.msra.mxu3 %v2941_v23  ;;  %v2174_v17 = vld [vmem:[#allocation9 + $0x10] sm:$0xf0] }
  0xd0   :  { %v462_v19 = vunpack.c.l.b16 %v412_v3  ;;  %v3046_v29 = vor.u32 %v2508_v11, %v2174_v17 }
  0xd2   :  { %1119 = vmatpush.bf16.msra.mxu0 %v3004_v16  ;;  %1132 = vmatpush.bf16.msrb.mxu1 %v3008_v24 }
  0xd3   :  { %1145 = vmatpush.bf16.msrb.mxu2 %v3010_v1  ;;  %1225 = vmatpush.bf16.msra.mxu3 %v2944_v43 }
  0xd5   :  { %v386_v45 = vpop.f32.mrf.mxu3 }
  0xd6   :  { %v387_v51 = vadd.f32 %v386_v45, %v157_v13  ;;  %1120 = vmatpush.bf16.msra.mxu0 %v3014_v33  ;;  %1133 = vmatpush.bf16.msrb.mxu1 %v3018_v35  ;;  %v2180_v13 = vld [vmem:[#allocation9 + $0x8] sm:$0xf]  ;;  %v449_v45 = vperm.slane %v446_v40, 1 }
  0xd7   :  { %1146 = vmatpush.bf16.msrb.mxu2 %v3020_v36  ;;  %v3048_v30 = vor.u32 %v2511_v18, %v2180_v13  ;;  %1226 = vmatpush.bf16.msra.mxu3 %v2948_v59 }
  0xd8   :  { %v401_v54 = vmax.f32 %v387_v51, 0.0 }
  0xda   :  { %v409_v4 = vmax.f32 %v408_v50, %v401_v54  ;;  %1121 = vmatpush.bf16.msra.mxu0 %v3024_v52  ;;  %1134 = vmatpush.bf16.msrb.mxu1 %v3028_v55  ;;  %v451_v54 = vperm.slane %v446_v40, 3 }
  0xdb   :  { %1147 = vmatpush.bf16.msrb.mxu2 %v3030_v56  ;;  %1227 = vmatpush.bf16.msra.mxu3 %v2953_v15 }
  0xdc   :  { %v413_v6 = vpack.c.bf16 %v409_v4, %v409_v4 }
  0xdd   :  { %v388_v12 = vpop.f32.mrf.mxu3 }
  0xde   :  { %v463_v25 = vunpack.c.l.b16 %v413_v6  ;;  %1122 = vmatpush.bf16.msra.mxu0 %v3034_v5  ;;  %1135 = vmatpush.bf16.msrb.mxu1 %v3038_v8 }
  0xdf   :  { %1148 = vmatpush.bf16.msrb.mxu2 %v3040_v9  ;;  %1228 = vmatpush.bf16.msra.mxu3 %v2970_v37 }
  0xe0   :  { %v465_v28 = vpack.c.b16 %v463_v25, %v462_v19 }
  0xe2   :  { %641 = vmatmul.bf16.gmra.mxu0 %v465_v28  ;;  %660 = vmatmul.bf16.gmra.mxu1 %v465_v28 }
  0xe3   :  { %679 = vmatmul.bf16.gmra.mxu2 %v465_v28  ;;  %698 = vmatmul.bf16.gmra.mxu3 %v465_v28  ;;  %v738_v28 = vperm.slane %v736_v26, 0 }
  0xe4   :  { %1123 = vmatpush.bf16.msra.mxu0 %v3046_v29  ;;  %1136 = vmatpush.bf16.msrb.mxu1 %v3048_v30 }
  0xe5   :  { %1149 = vmatpush.bf16.msrb.mxu2 %v3050_v31  ;;  %1229 = vmatpush.bf16.msra.mxu3 %v2987_v57 }
  0xe9   :  { %1230 = vmatpush.bf16.msra.mxu3 %v3002_v14 }
  0xf2   :  { %880 = vmatmul.bf16.vlgmr.msrb.gmra.mxu0 %v413_v6  ;;  %893 = vmatmul.bf16.vlgmr.msra.gmra.mxu1 %v413_v6 }
  0xf3   :  { %906 = vmatmul.bf16.vlgmr.msra.gmra.mxu2 %v413_v6  ;;  %1111 = vmatmul.bf16.vlgmr.msrb.gmra.mxu3 %v2825_v32 }
  0xf4   :  { %1236 = vmatpush.bf16.msrb.mxu0 %v2960_v21  ;;  %1249 = vmatpush.bf16.msra.mxu1 %v2962_v22 }
  0xf5   :  { %1262 = vmatpush.bf16.msra.mxu2 %v2964_v27  ;;  %1343 = vmatpush.bf16.msrb.mxu3 %v2934_v2 }
  0xf8   :  { %1237 = vmatpush.bf16.msrb.mxu0 %v2972_v38  ;;  %1250 = vmatpush.bf16.msra.mxu1 %v2976_v41 }
  0xf9   :  { %1263 = vmatpush.bf16.msra.mxu2 %v2978_v42  ;;  %1344 = vmatpush.bf16.msrb.mxu3 %v2941_v23 }
  0xfc   :  { %1238 = vmatpush.bf16.msrb.mxu0 %v2989_v60  ;;  %1251 = vmatpush.bf16.msra.mxu1 %v2994_v10 }
  0xfd   :  { %1264 = vmatpush.bf16.msra.mxu2 %v2996_v58  ;;  %1345 = vmatpush.bf16.msrb.mxu3 %v2944_v43 }
 0x100   :  { %1239 = vmatpush.bf16.msrb.mxu0 %v3004_v16  ;;  %1252 = vmatpush.bf16.msra.mxu1 %v3008_v24 }
 0x101   :  { %1265 = vmatpush.bf16.msra.mxu2 %v3010_v1  ;;  %1346 = vmatpush.bf16.msrb.mxu3 %v2948_v59 }
 0x102   :  { %1124 = vmatmul.bf16.vlgmr.msra.gmra.mxu0 %v2825_v32  ;;  %1137 = vmatmul.bf16.vlgmr.msrb.gmra.mxu1 %v2825_v32 }
 0x103   :  { %1150 = vmatmul.bf16.vlgmr.msrb.gmra.mxu2 %v2825_v32 }
 0x104   :  { %1240 = vmatpush.bf16.msrb.mxu0 %v3014_v33  ;;  %1253 = vmatpush.bf16.msra.mxu1 %v3018_v35 }
 0x105   :  { %1266 = vmatpush.bf16.msra.mxu2 %v3020_v36  ;;  %1347 = vmatpush.bf16.msrb.mxu3 %v2953_v15 }
 0x108   :  { %1241 = vmatpush.bf16.msrb.mxu0 %v3024_v52  ;;  %1254 = vmatpush.bf16.msra.mxu1 %v3028_v55 }
 0x109   :  { %1267 = vmatpush.bf16.msra.mxu2 %v3030_v56  ;;  %1348 = vmatpush.bf16.msrb.mxu3 %v2970_v37 }
 0x10c   :  { %1242 = vmatpush.bf16.msrb.mxu0 %v3034_v5  ;;  %1255 = vmatpush.bf16.msra.mxu1 %v3038_v8 }
 0x10d   :  { %1268 = vmatpush.bf16.msra.mxu2 %v3040_v9  ;;  %1349 = vmatpush.bf16.msrb.mxu3 %v2987_v57 }
 0x110   :  { %1243 = vmatpush.bf16.msrb.mxu0 %v3046_v29  ;;  %1256 = vmatpush.bf16.msra.mxu1 %v3048_v30 }
 0x111   :  { %1269 = vmatpush.bf16.msra.mxu2 %v3050_v31  ;;  %1350 = vmatpush.bf16.msrb.mxu3 %v3002_v14 }
 0x114   :  { %1356 = vmatpush.bf16.msra.mxu0 %v2960_v21  ;;  %1369 = vmatpush.bf16.msrb.mxu1 %v2962_v22 }
 0x115   :  { %1382 = vmatpush.bf16.msrb.mxu2 %v2964_v27 }
 0x118   :  { %1357 = vmatpush.bf16.msra.mxu0 %v2972_v38  ;;  %1370 = vmatpush.bf16.msrb.mxu1 %v2976_v41 }
 0x119   :  { %1383 = vmatpush.bf16.msrb.mxu2 %v2978_v42 }
 0x11c   :  { %1358 = vmatpush.bf16.msra.mxu0 %v2989_v60  ;;  %1371 = vmatpush.bf16.msrb.mxu1 %v2994_v10 }
 0x11d   :  { %1384 = vmatpush.bf16.msrb.mxu2 %v2996_v58 }
 0x120   :  { %1359 = vmatpush.bf16.msra.mxu0 %v3004_v16  ;;  %1372 = vmatpush.bf16.msrb.mxu1 %v3008_v24 }
 0x121   :  { %1385 = vmatpush.bf16.msrb.mxu2 %v3010_v1 }
 0x124   :  { %1360 = vmatpush.bf16.msra.mxu0 %v3014_v33  ;;  %1373 = vmatpush.bf16.msrb.mxu1 %v3018_v35 }
 0x125   :  { %1386 = vmatpush.bf16.msrb.mxu2 %v3020_v36 }
 0x128   :  { %1361 = vmatpush.bf16.msra.mxu0 %v3024_v52  ;;  %1374 = vmatpush.bf16.msrb.mxu1 %v3028_v55 }
 0x129   :  { %1387 = vmatpush.bf16.msrb.mxu2 %v3030_v56 }
 0x12c   :  { %1362 = vmatpush.bf16.msra.mxu0 %v3034_v5  ;;  %1375 = vmatpush.bf16.msrb.mxu1 %v3038_v8 }
 0x12d   :  { %1388 = vmatpush.bf16.msrb.mxu2 %v3040_v9 }
 0x130   :  { %1363 = vmatpush.bf16.msra.mxu0 %v3046_v29  ;;  %1376 = vmatpush.bf16.msrb.mxu1 %v3048_v30 }
 0x131   :  { %1389 = vmatpush.bf16.msrb.mxu2 %v3050_v31 }
 0x141   :  { %v637_v34 = vpop.f32.mrf.mxu0  ;;  %v656_v39 = vpop.f32.mrf.mxu1 }
 0x148   :  { %v3116_v46 = vpop.f32.mrf.mxu2  ;;  %v3118_v47 = vpop.f32.mrf.mxu3 }
 0x149   :  { %v639_v48 = vpop.f32.mrf.mxu0  ;;  %v658_v49 = vpop.f32.mrf.mxu1 }
 0x14a   :  { %v3120_v50 = vadd.f32 %v639_v48, %v448_v44  ;;  %v3122_v51 = vadd.f32 %v658_v49, %v449_v45 }
 0x150   :  { %v677_v61 = vpop.f32.mrf.mxu2  ;;  %v696_v62 = vpop.f32.mrf.mxu3 }
 0x151   :  { %v3127_v63 = vadd.f32 %v677_v61, %v3124_v53  ;;  %v3129_v7 = vadd.f32 %v696_v62, %v451_v54 }
 0x153   :  { %3284 = vst [vmem:[#allocation16_spill] sm:$0xff] %v3127_v63 }
 0x15f   :  { %v642_v0 = vpop.f32.mrf.mxu0  ;;  %v661_v3 = vpop.f32.mrf.mxu1 }
 0x160   :  { %v3131_v4 = vadd.f32 %v642_v0, %v448_v44  ;;  %v3133_v6 = vadd.f32 %v661_v3, %v449_v45 }
 0x162   :  { %3285 = vst [vmem:[#allocation17_spill] sm:$0xff] %v3131_v4 }
 0x163   :  { %3286 = vst [vmem:[#allocation18_spill] sm:$0xff] %v3133_v6 }
 0x166   :  { %v680_v11 = vpop.f32.mrf.mxu2  ;;  %v699_v12 = vpop.f32.mrf.mxu3 }
 0x167   :  { %v3136_v17 = vadd.f32 %v680_v11, %v3124_v53  ;;  %v3138_v13 = vadd.f32 %v699_v12, %v451_v54  ;;  %v644_v18 = vpop.f32.mrf.mxu0  ;;  %v663_v19 = vpop.f32.mrf.mxu1  ;;  %v740_v11 = vperm.slane %v736_v26, 3  ;;  %v638_v12 = vadd.f32 %v637_v34, %v448_v44 }
 0x168   :  { %v3140_v25 = vadd.f32 %v644_v18, %v448_v44  ;;  %v3142_v20 = vadd.f32 %v663_v19, %v449_v45 }
 0x169   :  { %3287 = vst [vmem:[#allocation19_spill] sm:$0xff] %v3136_v17 }
 0x16a   :  { %3288 = vst [vmem:[#allocation20_spill] sm:$0xff] %v3138_v13 }
 0x16b   :  { %3289 = vst [vmem:[#allocation21_spill] sm:$0xff] %v3140_v25 }
 0x16c   :  { %3290 = vst [vmem:[#allocation22_spill] sm:$0xff] %v3142_v20 }
 0x16e   :  { %v682_v32 = vpop.f32.mrf.mxu2  ;;  %v701_v40 = vpop.f32.mrf.mxu3 }
 0x16f   :  { %v3148_v48 = vadd.f32 %v682_v32, %v3124_v53  ;;  %v3150_v49 = vadd.f32 %v701_v40, %v451_v54  ;;  %v881_v61 = vpop.f32.mrf.mxu0  ;;  %v894_v62 = vpop.f32.mrf.mxu1  ;;  %v657_v40 = vadd.f32 %v656_v39, %v449_v45 }
 0x170   :  { %v882_v0 = vadd.f32 %v881_v61, %v738_v28  ;;  %v739_v61 = vperm.slane %v736_v26, 2 }
 0x171   :  { %3291 = vst [vmem:[#allocation23_spill] sm:$0xff] %v3148_v48 }
 0x172   :  { %3292 = vst [vmem:[#allocation24_spill] sm:$0xff] %v3150_v49  ;;  %v2310_v3 = vmul.f32 -1.442695, %v882_v0 }
 0x174   :  { %2585 = vpow2.f32 %v2310_v3 }
 0x176   :  { %v907_v18 = vpop.f32.mrf.mxu2  ;;  %v1112_v19 = vpop.f32.mrf.mxu3 }
 0x177   :  { %v908_v25 = vadd.f32 %v907_v18, %v740_v11  ;;  %v1155_v20 = vadd.f32 %v1112_v19, %v638_v12  ;;  %v883_v17 = vpop.f32.mrf.mxu0  ;;  %v896_v13 = vpop.f32.mrf.mxu1 }
 0x178   :  { %v895_v13 = vadd.f32 %v894_v62, %v739_v61 }
 0x179   :  { %v2311_v4 = vmul.f32 -1.442695, %v908_v25  ;;  %v2298_v6 = vmul.f32 -1.442695, %v1155_v20 }
 0x17a   :  { %v2586_v63 = vpop.eup %2585 }
 0x17b   :  { %v1585_v32 = vadd.f32 1.0, %v2586_v63  ;;  %2587 = vpow2.f32 %v2311_v4  ;;  %v695_v63 = vadd.f32 %v3118_v47, %v451_v54 }
 0x17c   :  { %2589 = vpow2.f32 %v2298_v6 }
 0x17d   :  { %2591 = vrcp.f32 %v1585_v32  ;;  %v1597_v4 = vand.u32 2147483648, %v1585_v32  ;;  %v1595_v19 = vand.u32 2147483647, %v1585_v32  ;;  %vm1591_vm2 = vweird.f32 %v1585_v32 }
 0x17e   :  { %v909_v48 = vpop.f32.mrf.mxu2  ;;  %v1114_v28 = vpop.f32.mrf.mxu3 }
 0x17f   :  { %v1125_v0 = vpop.f32.mrf.mxu0  ;;  %v1138_v3 = vpop.f32.mrf.mxu1  ;;  %v1598_v47 = vor.u32 1.1754944e-38, %v1597_v4  ;;  %vm1596_vm4 = vcmp.eq.f32.partialorder %v1595_v19, 8.507059e+37  ;;  %v676_v19 = vadd.f32 %v3116_v46, %v3124_v53 }
 0x180   :  { %v1156_v34 = vadd.f32 %v1125_v0, %v657_v40 }
 0x181   :  { %v2588_v44 = vpop.eup %2587 }
 0x182   :  { %v2590_v49 = vpop.eup %2589  ;;  %v1605_v11 = vadd.f32 1.0, %v2588_v44  ;;  %v2299_v12 = vmul.f32 -1.442695, %v1156_v34 }
 0x183   :  { %v2592_v17 = vpop.eup %2591  ;;  %v3152_v25 = vadd.f32 1.0, %v2590_v49 }
 0x184   :  { %v1587_v20 = vmul.f32 %v2592_v17, %v1585_v32  ;;  %2593 = vrcp.f32 %v1605_v11  ;;  %vm1592_vm1 = vweird.f32 %v2592_v17  ;;  %v1617_v4 = vand.u32 2147483648, %v1605_v11 }
 0x185   :  { %2595 = vrcp.f32 %v3152_v25  ;;  %vm1593_vm3 = vmor %vm1591_vm2, %vm1592_vm1  ;;  %vm1611_vm6 = vweird.f32 %v1605_v11  ;;  %vm1168_vm10 = vweird.f32 %v3152_v25  ;;  %v1172_v46 = vand.u32 2147483647, %v3152_v25 }
 0x186   :  { %v1588_v39 = vsub.f32 1.0, %v1587_v20  ;;  %2597 = vpow2.f32 %v2299_v12  ;;  %v1151_v45 = vpop.f32.mrf.mxu2 }
 0x187   :  { %2599 = vtanh.f32 %v895_v13  ;;  %v1158_v6 = vadd.f32 %v1151_v45, %v695_v63  ;;  %v1127_v26 = vpop.f32.mrf.mxu0  ;;  %v1140_v48 = vpop.f32.mrf.mxu1  ;;  %vm1173_vm14 = vcmp.eq.f32.partialorder %v1172_v46, 8.507059e+37 }
 0x188   :  { %v1589_v18 = vmul.f32 %v2592_v17, %v1588_v39 }
 0x189   :  { %v2300_v62 = vmul.f32 -1.442695, %v1158_v6 }
 0x18a   :  { %v2594_v49 = vpop.eup %2593  ;;  %v1590_v40 = vadd.f32 %v2592_v17, %v1589_v18 }
 0x18b   :  { %v2596_v28 = vpop.eup %2595  ;;  %v1607_v54 = vmul.f32 %v2594_v49, %v1605_v11  ;;  %2601 = vpow2.f32 %v2300_v62  ;;  %vm1612_vm5 = vweird.f32 %v2594_v49 }
 0x18c   :  { %v2598_v61 = vpop.eup %2597  ;;  %v1594_v0 = vsel %vm1593_vm3, %v2592_v17, %v1590_v40  ;;  %v1164_v34 = vmul.f32 %v2596_v28, %v3152_v25  ;;  %v1615_v17 = vand.u32 2147483647, %v1605_v11  ;;  %vm1613_vm7 = vmor %vm1611_vm6, %vm1612_vm5  ;;  %v1157_v40 = vadd.f32 %v1138_v3, %v676_v19 }
 0x18d   :  { %v2600_v44 = vpop.eup %2599  ;;  %v1599_v12 = vsel %vm1596_vm4, %v1598_v47, %v1594_v0  ;;  %v1608_v13 = vsub.f32 1.0, %v1607_v54  ;;  %v1181_v20 = vadd.f32 1.0, %v2598_v61  ;;  %v1618_v54 = vor.u32 1.1754944e-38, %v1617_v4 }
 0x18e   :  { %v1621_v63 = vmul.f32 %v2600_v44, %v1599_v12  ;;  %v1165_v39 = vsub.f32 1.0, %v1164_v34  ;;  %v1153_v45 = vpop.f32.mrf.mxu2  ;;  %vm1169_vm8 = vweird.f32 %v2596_v28  ;;  %vm1616_vm9 = vcmp.eq.f32.partialorder %v1615_v17, 8.507059e+37 }
 0x18f   :  { %2603 = vrcp.f32 %v1181_v20  ;;  %v1609_v32 = vmul.f32 %v2594_v49, %v1608_v13  ;;  %v1174_v44 = vand.u32 2147483648, %v3152_v25  ;;  %v1193_v11 = vand.u32 2147483648, %v1181_v20  ;;  %vm1170_vm11 = vmor %vm1168_vm10, %vm1169_vm8 }
 0x190   :  { %2605 = vtanh.f32 %v1621_v63  ;;  %v1166_v26 = vmul.f32 %v2596_v28, %v1165_v39  ;;  %v1191_v39 = vand.u32 2147483647, %v1181_v20  ;;  %vm1187_vm13 = vweird.f32 %v1181_v20 }
 0x191   :  { %v2602_v6 = vpop.eup %2601  ;;  %v1610_v18 = vadd.f32 %v2594_v49, %v1609_v32  ;;  %v1175_v45 = vor.u32 1.1754944e-38, %v1174_v44  ;;  %v1194_v4 = vor.u32 1.1754944e-38, %v1193_v11 }
 0x192   :  { %v1201_v48 = vadd.f32 1.0, %v2602_v6  ;;  %v1167_v34 = vadd.f32 %v2596_v28, %v1166_v26  ;;  %vm1192_vm0 = vcmp.eq.f32.partialorder %v1191_v39, 8.507059e+37 }
 0x193   :  { %v1614_v47 = vsel %vm1613_vm7, %v2594_v49, %v1610_v18 }
 0x194   :  { %2607 = vrcp.f32 %v1201_v48  ;;  %v1619_v12 = vsel %vm1616_vm9, %v1618_v54, %v1614_v47  ;;  %v1171_v63 = vsel %vm1170_vm11, %v2596_v28, %v1167_v34  ;;  %vm1207_vm2 = vweird.f32 %v1201_v48 }
 0x195   :  { %v2604_v62 = vpop.eup %2603  ;;  %2609 = vtanh.f32 %v1157_v40  ;;  %v1176_v26 = vsel %vm1173_vm14, %v1175_v45, %v1171_v63 }
 0x196   :  { %v2606_v61 = vpop.eup %2605  ;;  %v1183_v0 = vmul.f32 %v2604_v62, %v1181_v20  ;;  %vm1188_vm12 = vweird.f32 %v2604_v62  ;;  %v1213_v20 = vand.u32 2147483648, %v1201_v48 }
 0x197   :  { %v3162_v53 = vmul.f32 %v2606_v61, %v1619_v12  ;;  %vm1189_vm15 = vmor %vm1187_vm13, %vm1188_vm12 }
 0x198   :  { %v1184_v13 = vsub.f32 1.0, %v1183_v0  ;;  %v1211_v0 = vand.u32 2147483647, %v1201_v48  ;;  %v1214_v44 = vor.u32 1.1754944e-38, %v1213_v20 }
 0x19a   :  { %v2608_v3 = vpop.eup %2607  ;;  %v1185_v49 = vmul.f32 %v2604_v62, %v1184_v13  ;;  %vm1212_vm4 = vcmp.eq.f32.partialorder %v1211_v0, 8.507059e+37 }
 0x19b   :  { %v1203_v32 = vmul.f32 %v2608_v3, %v1201_v48  ;;  %v2610_v17 = vpop.eup %2609  ;;  %vm1208_vm1 = vweird.f32 %v2608_v3 }
 0x19c   :  { %v1186_v6 = vadd.f32 %v2604_v62, %v1185_v49  ;;  %v1218_v54 = vmul.f32 %v2610_v17, %v1176_v26  ;;  %vm1209_vm3 = vmor %vm1207_vm2, %vm1208_vm1 }
 0x19d   :  { %v1204_v18 = vsub.f32 1.0, %v1203_v32 }
 0x19e   :  { %v1190_v25 = vsel %vm1189_vm15, %v2604_v62, %v1186_v6 }
 0x19f   :  { %v1195_v19 = vsel %vm1192_vm0, %v1194_v4, %v1190_v25  ;;  %v1205_v47 = vmul.f32 %v2608_v3, %v1204_v18 }
 0x1a0   :  { %v1217_v40 = vmul.f32 0.0, %v1195_v19 }
 0x1a1   :  { %v1206_v28 = vadd.f32 %v2608_v3, %v1205_v47 }
 0x1a2   :  { %v3164_v61 = vadd.f32 %v1218_v54, %v1217_v40 }
 0x1a3   :  { %v1210_v34 = vsel %vm1209_vm3, %v2608_v3, %v1206_v28 }
 0x1a4   :  { %2611 = vtanh.f32 %v3164_v61  ;;  %v1215_v12 = vsel %vm1212_vm4, %v1214_v44, %v1210_v34 }
 0x1aa   :  { %v2612_v62 = vpop.eup %2611 }
 0x1ab   :  { %v1221_v13 = vmul.f32 %v2612_v62, %v1215_v12  ;;  %v3294_v12 = vld [vmem:[#allocation18_spill] sm:$0xff] }
 0x1ad   :  { %v1222_v46 = vpack.c.bf16 %v1221_v13, %v1221_v13 }
 0x1af   :  { %1231 = vmatmul.bf16.vlgmr.msra.gmra.mxu3 %v1222_v46  ;;  %1244 = vmatmul.bf16.vlgmr.msrb.gmra.mxu0 %v1222_v46 }
 0x1b0   :  { %1257 = vmatmul.bf16.vlgmr.msra.gmra.mxu1 %v1222_v46  ;;  %1270 = vmatmul.bf16.vlgmr.msra.gmra.mxu2 %v1222_v46 }
 0x1b1   :  { %1476 = vmatpush.bf16.msrb.mxu0 %v2960_v21  ;;  %1502 = vmatpush.bf16.msra.mxu2 %v2964_v27 }
 0x1b2   :  { %1463 = vmatpush.bf16.msra.mxu3 %v2934_v2  ;;  %1489 = vmatpush.bf16.msra.mxu1 %v2962_v22 }
 0x1b5   :  { %1477 = vmatpush.bf16.msrb.mxu0 %v2972_v38  ;;  %1503 = vmatpush.bf16.msra.mxu2 %v2978_v42 }
 0x1b6   :  { %1464 = vmatpush.bf16.msra.mxu3 %v2941_v23  ;;  %1490 = vmatpush.bf16.msra.mxu1 %v2976_v41 }
 0x1b9   :  { %1478 = vmatpush.bf16.msrb.mxu0 %v2989_v60  ;;  %1504 = vmatpush.bf16.msra.mxu2 %v2996_v58 }
 0x1ba   :  { %1465 = vmatpush.bf16.msra.mxu3 %v2944_v43  ;;  %1491 = vmatpush.bf16.msra.mxu1 %v2994_v10 }
 0x1bd   :  { %1479 = vmatpush.bf16.msrb.mxu0 %v3004_v16  ;;  %1505 = vmatpush.bf16.msra.mxu2 %v3010_v1 }
 0x1be   :  { %1466 = vmatpush.bf16.msra.mxu3 %v2948_v59  ;;  %1492 = vmatpush.bf16.msra.mxu1 %v3008_v24 }
 0x1c1   :  { %1480 = vmatpush.bf16.msrb.mxu0 %v3014_v33  ;;  %1506 = vmatpush.bf16.msra.mxu2 %v3020_v36 }
 0x1c2   :  { %1467 = vmatpush.bf16.msra.mxu3 %v2953_v15  ;;  %1493 = vmatpush.bf16.msra.mxu1 %v3018_v35 }
 0x1c5   :  { %1481 = vmatpush.bf16.msrb.mxu0 %v3024_v52  ;;  %1507 = vmatpush.bf16.msra.mxu2 %v3030_v56  ;;  %v3293_v56 = vld [vmem:[#allocation16_spill] sm:$0xff] }
 0x1c6   :  { %1468 = vmatpush.bf16.msra.mxu3 %v2970_v37  ;;  %1494 = vmatpush.bf16.msra.mxu1 %v3028_v55 }
 0x1c9   :  { %1482 = vmatpush.bf16.msrb.mxu0 %v3034_v5  ;;  %1508 = vmatpush.bf16.msra.mxu2 %v3040_v9 }
 0x1ca   :  { %1469 = vmatpush.bf16.msra.mxu3 %v2987_v57  ;;  %1495 = vmatpush.bf16.msra.mxu1 %v3038_v8 }
 0x1cd   :  { %1483 = vmatpush.bf16.msrb.mxu0 %v3046_v29  ;;  %1509 = vmatpush.bf16.msra.mxu2 %v3050_v31 }
 0x1ce   :  { %1470 = vmatpush.bf16.msra.mxu3 %v3002_v14  ;;  %1496 = vmatpush.bf16.msra.mxu1 %v3048_v30 }
 0x22c   :  { %v1245_v2 = vpop.f32.mrf.mxu0 }
 0x22d   :  { %v1276_v23 = vadd.f32 %v1245_v2, %v3122_v51  ;;  %v1258_v43 = vpop.f32.mrf.mxu1 }
 0x22e   :  { %v1277_v5 = vadd.f32 %v1258_v43, %v3293_v56  ;;  %v2571_v43 = vld [vmem:[#allocation10 + $0xf4] sm:$0xf0]  ;;  %v2420_v56 = vld [vmem:[#allocation10 + $0xd8] sm:$0xf0] }
 0x22f   :  { %v2302_v59 = vmul.f32 -1.442695, %v1276_v23  ;;  %v2434_v23 = vld [vmem:[#allocation10 + $0xf0] sm:$0xf] }
 0x231   :  { %2613 = vpow2.f32 %v2302_v59  ;;  %v2570_v59 = vld [vmem:[#allocation10 + $0xf4] sm:$0xf] }
 0x232   :  { %v1232_v15 = vpop.f32.mrf.mxu3 }
 0x233   :  { %v1275_v21 = vadd.f32 %v1232_v15, %v3120_v50  ;;  %v1271_v22 = vpop.f32.mrf.mxu2  ;;  %v2435_v15 = vor.u32 %v2571_v43, %v2434_v23  ;;  %v2559_v43 = vld [vmem:[#allocation10 + $0x94] sm:$0xf0] }
 0x234   :  { %v1278_v27 = vadd.f32 %v1271_v22, %v3129_v7  ;;  %v1247_v37 = vpop.f32.mrf.mxu0  ;;  %v2426_v22 = vld [vmem:[#allocation10 + $0xe0] sm:$0xf] }
 0x235   :  { %v2301_v38 = vmul.f32 -1.442695, %v1275_v21  ;;  %v1260_v41 = vpop.f32.mrf.mxu1  ;;  %v2436_v21 = vld [vmem:[#allocation10 + $0xf8] sm:$0xf0] }
 0x236   :  { %v2303_v42 = vmul.f32 -1.442695, %v1278_v27  ;;  %v2569_v27 = vld [vmem:[#allocation10 + $0xe4] sm:$0xf0]  ;;  %v2568_v41 = vld [vmem:[#allocation10 + $0xe4] sm:$0xf] }
 0x237   :  { %v2614_v57 = vpop.eup %2613  ;;  %2615 = vpow2.f32 %v2301_v38  ;;  %v2439_v38 = vor.u32 %v2570_v59, %v2436_v21  ;;  %v2558_v59 = vld [vmem:[#allocation10 + $0x94] sm:$0xf] }
 0x238   :  { %v1301_v60 = vadd.f32 1.0, %v2614_v57  ;;  %2617 = vpow2.f32 %v2303_v42  ;;  %v2428_v42 = vld [vmem:[#allocation10 + $0xe8] sm:$0xf0] }
 0x239   :  { %v3295_v57 = vld [vmem:[#allocation17_spill] sm:$0xff] }
 0x23a   :  { %2619 = vrcp.f32 %v1301_v60  ;;  %v1234_v10 = vpop.f32.mrf.mxu3  ;;  %v1313_v30 = vand.u32 2147483648, %v1301_v60  ;;  %vm1307_vm6 = vweird.f32 %v1301_v60  ;;  %v1311_v50 = vand.u32 2147483647, %v1301_v60 }
 0x23b   :  { %v1273_v58 = vpop.f32.mrf.mxu2 }
 0x23c   :  { %v1314_v49 = vor.u32 1.1754944e-38, %v1313_v30  ;;  %vm1312_vm9 = vcmp.eq.f32.partialorder %v1311_v50, 8.507059e+37  ;;  %v2427_v58 = vor.u32 %v2569_v27, %v2426_v22  ;;  %v2565_v50 = vld [vmem:[#allocation10 + $0xc4] sm:$0xf0] }
 0x23d   :  { %v2616_v14 = vpop.eup %2615 }
 0x23e   :  { %v2618_v16 = vpop.eup %2617  ;;  %v1282_v24 = vadd.f32 1.0, %v2616_v14  ;;  %v3296_v14 = vld [vmem:[#allocation20_spill] sm:$0xff] }
 0x23f   :  { %v1321_v1 = vadd.f32 1.0, %v2618_v16 }
 0x240   :  { %v2620_v33 = vpop.eup %2619  ;;  %2621 = vrcp.f32 %v1282_v24  ;;  %v1294_v7 = vand.u32 2147483648, %v1282_v24  ;;  %v1292_v3 = vand.u32 2147483647, %v1282_v24  ;;  %vm1288_vm10 = vweird.f32 %v1282_v24 }
 0x241   :  { %v1303_v35 = vmul.f32 %v2620_v33, %v1301_v60  ;;  %2623 = vrcp.f32 %v1321_v1  ;;  %vm1308_vm5 = vweird.f32 %v2620_v33  ;;  %v1333_v40 = vand.u32 2147483648, %v1321_v1 }
 0x242   :  { %vm1309_vm7 = vmor %vm1307_vm6, %vm1308_vm5  ;;  %2625 = vtanh.f32 %v1277_v5  ;;  %v1295_v32 = vor.u32 1.1754944e-38, %v1294_v7  ;;  %vm1293_vm12 = vcmp.eq.f32.partialorder %v1292_v3, 8.507059e+37  ;;  %vm1327_vm14 = vweird.f32 %v1321_v1  ;;  %v2412_v7 = vld [vmem:[#allocation10 + $0xc8] sm:$0xf0] }
 0x243   :  { %v1304_v36 = vsub.f32 1.0, %v1303_v35  ;;  %v1331_v54 = vand.u32 2147483647, %v1321_v1  ;;  %v1334_v20 = vor.u32 1.1754944e-38, %v1333_v40  ;;  %v2567_v35 = vld [vmem:[#allocation10 + $0xd4] sm:$0xf0] }
 0x245   :  { %v1305_v52 = vmul.f32 %v2620_v33, %v1304_v36  ;;  %vm1332_vm0 = vcmp.eq.f32.partialorder %v1331_v54, 8.507059e+37 }
 0x246   :  { %v2622_v55 = vpop.eup %2621 }
 0x247   :  { %v2624_v8 = vpop.eup %2623  ;;  %v1306_v9 = vadd.f32 %v2620_v33, %v1305_v52  ;;  %v1284_v29 = vmul.f32 %v2622_v55, %v1282_v24  ;;  %vm1289_vm8 = vweird.f32 %v2622_v55 }
 0x248   :  { %v1323_v31 = vmul.f32 %v2624_v8, %v1321_v1  ;;  %vm1290_vm11 = vmor %vm1288_vm10, %vm1289_vm8  ;;  %v2626_v4 = vpop.eup %2625  ;;  %vm1328_vm13 = vweird.f32 %v2624_v8  ;;  %v2431_v1 = vor.u32 %v2568_v41, %v2428_v42 }
 0x249   :  { %v1285_v51 = vsub.f32 1.0, %v1284_v29  ;;  %v1310_v48 = vsel %vm1309_vm7, %v2620_v33, %v1306_v9  ;;  %vm1329_vm15 = vmor %vm1327_vm14, %vm1328_vm13  ;;  %v2418_v33 = vld [vmem:[#allocation10 + $0xd0] sm:$0xf] }
 0x24a   :  { %v1324_v63 = vsub.f32 1.0, %v1323_v31  ;;  %v1315_v45 = vsel %vm1312_vm9, %v1314_v49, %v1310_v48  ;;  %v2419_v9 = vor.u32 %v2567_v35, %v2418_v33  ;;  %v2410_v31 = vld [vmem:[#allocation10 + $0xc0] sm:$0xf] }
 0x24b   :  { %v1286_v11 = vmul.f32 %v2622_v55, %v1285_v51  ;;  %v1337_v25 = vmul.f32 %v1315_v45, %v3164_v61  ;;  %v2564_v51 = vld [vmem:[#allocation10 + $0xc4] sm:$0xf]  ;;  %v2411_v3 = vor.u32 %v2565_v50, %v2410_v31 }
 0x24c   :  { %v1325_v18 = vmul.f32 %v2624_v8, %v1324_v63  ;;  %v2415_v49 = vor.u32 %v2564_v51, %v2412_v7 }
 0x24d   :  { %v1287_v39 = vadd.f32 %v2622_v55, %v1286_v11 }
 0x24e   :  { %v1326_v47 = vadd.f32 %v2624_v8, %v1325_v18  ;;  %v2563_v18 = vld [vmem:[#allocation10 + $0xb4] sm:$0xf0] }
 0x24f   :  { %v1291_v6 = vsel %vm1290_vm11, %v2622_v55, %v1287_v39  ;;  %v2566_v55 = vld [vmem:[#allocation10 + $0xd4] sm:$0xf] }
 0x250   :  { %v1296_v26 = vsel %vm1293_vm12, %v1295_v32, %v1291_v6  ;;  %v1330_v28 = vsel %vm1329_vm15, %v2624_v8, %v1326_v47  ;;  %v2423_v30 = vor.u32 %v2566_v55, %v2420_v56 }
 0x251   :  { %v1338_v17 = vmul.f32 %v2626_v4, %v1296_v26  ;;  %v1335_v34 = vsel %vm1332_vm0, %v1334_v20, %v1330_v28  ;;  %v2402_v4 = vld [vmem:[#allocation10 + $0xb0] sm:$0xf]  ;;  %v2394_v28 = vld [vmem:[#allocation10 + $0xa0] sm:$0xf]  ;;  %v2561_v20 = vld [vmem:[#allocation10 + $0xa4] sm:$0xf0] }
 0x252   :  { %v2403_v40 = vor.u32 %v2563_v18, %v2402_v4  ;;  %v2370_v18 = vld [vmem:[#allocation10 + $0x70] sm:$0xf] }
 0x253   :  { %v3204_v19 = vadd.f32 %v1338_v17, %v1337_v25  ;;  %v2562_v25 = vld [vmem:[#allocation10 + $0xb4] sm:$0xf]  ;;  %v2404_v17 = vld [vmem:[#allocation10 + $0xb8] sm:$0xf0] }
 0x254   :  { %v2407_v54 = vor.u32 %v2562_v25, %v2404_v17  ;;  %v2555_v25 = vld [vmem:[#allocation10 + $0x74] sm:$0xf0] }
 0x255   :  { %2627 = vtanh.f32 %v3204_v19  ;;  %v2371_v17 = vor.u32 %v2555_v25, %v2370_v18 }
 0x25b   :  { %v2628_v0 = vpop.eup %2627 }
 0x25c   :  { %v1341_v44 = vmul.f32 %v2628_v0, %v1335_v34  ;;  %v2560_v0 = vld [vmem:[#allocation10 + $0xa4] sm:$0xf]  ;;  %v2396_v34 = vld [vmem:[#allocation10 + $0xa8] sm:$0xf0] }
 0x25e   :  { %v1342_v62 = vpack.c.bf16 %v1341_v44, %v1341_v44 }
 0x260   :  { %1351 = vmatmul.bf16.vlgmr.msrb.gmra.mxu3 %v1342_v62  ;;  %1364 = vmatmul.bf16.vlgmr.msra.gmra.mxu0 %v1342_v62 }
 0x261   :  { %1377 = vmatmul.bf16.vlgmr.msrb.gmra.mxu1 %v1342_v62  ;;  %1390 = vmatmul.bf16.vlgmr.msrb.gmra.mxu2 %v1342_v62  ;;  %v2395_v62 = vor.u32 %v2561_v20, %v2394_v28  ;;  %v2553_v28 = vld [vmem:[#allocation10 + $0x64] sm:$0xf0]  ;;  %v2552_v20 = vld [vmem:[#allocation10 + $0x64] sm:$0xf] }
 0x262   :  { %1837 = vmatpush.bf16.msra.mxu0 %v2435_v15  ;;  %1863 = vmatpush.bf16.msrb.mxu2 %v2439_v38  ;;  %v2388_v15 = vld [vmem:[#allocation10 + $0x98] sm:$0xf0] }
 0x263   :  { %1824 = vmatpush.bf16.msrb.mxu3 %v2371_v17 }
 0x266   :  { %1838 = vmatpush.bf16.msra.mxu0 %v2427_v58  ;;  %1864 = vmatpush.bf16.msrb.mxu2 %v2431_v1  ;;  %v2378_v58 = vld [vmem:[#allocation10 + $0x80] sm:$0xf] }
 0x26a   :  { %1839 = vmatpush.bf16.msra.mxu0 %v2419_v9  ;;  %1865 = vmatpush.bf16.msrb.mxu2 %v2423_v30 }
 0x26e   :  { %1840 = vmatpush.bf16.msra.mxu0 %v2411_v3  ;;  %1866 = vmatpush.bf16.msrb.mxu2 %v2415_v49 }
 0x272   :  { %1841 = vmatpush.bf16.msra.mxu0 %v2403_v40  ;;  %1867 = vmatpush.bf16.msrb.mxu2 %v2407_v54  ;;  %v2362_v54 = vld [vmem:[#allocation10 + $0x60] sm:$0xf] }
 0x276   :  { %1842 = vmatpush.bf16.msra.mxu0 %v2395_v62  ;;  %v2354_v62 = vld [vmem:[#allocation10 + $0x50] sm:$0xf] }
 0x2dd   :  { %v1365_v61 = vpop.f32.mrf.mxu0 }
 0x2de   :  { %v1396_v13 = vadd.f32 %v1365_v61, %v3294_v12  ;;  %v3208_v46 = vpop.f32.mrf.mxu1  ;;  %v2399_v61 = vor.u32 %v2560_v0, %v2396_v34  ;;  %v2386_v12 = vld [vmem:[#allocation10 + $0x90] sm:$0xf]  ;;  %v2363_v0 = vor.u32 %v2553_v28, %v2362_v54  ;;  %v2364_v34 = vld [vmem:[#allocation10 + $0x68] sm:$0xf0] }
 0x2e0   :  { %v2305_v2 = vmul.f32 -1.442695, %v1396_v13  ;;  %1868 = vmatpush.bf16.msrb.mxu2 %v2399_v61  ;;  %1825 = vmatpush.bf16.msrb.mxu3 %v2363_v0  ;;  %v2550_v61 = vld [vmem:[#allocation10 + $0x54] sm:$0xf] }
 0x2e2   :  { %2629 = vpow2.f32 %v2305_v2  ;;  %v3297_v2 = vld [vmem:[#allocation19_spill] sm:$0xff] }
 0x2e3   :  { %v1352_v37 = vpop.f32.mrf.mxu3  ;;  %v1397_v23 = vadd.f32 %v3208_v46, %v3297_v2 }
 0x2e4   :  { %v1395_v60 = vadd.f32 %v1352_v37, %v3295_v57  ;;  %v1391_v10 = vpop.f32.mrf.mxu2 }
 0x2e5   :  { %v1398_v16 = vadd.f32 %v1391_v10, %v3296_v14  ;;  %v1367_v24 = vpop.f32.mrf.mxu0  ;;  %v2391_v10 = vor.u32 %v2558_v59, %v2388_v15  ;;  %v2557_v14 = vld [vmem:[#allocation10 + $0x84] sm:$0xf0]  ;;  %v2548_v15 = vld [vmem:[#allocation10 + $0x44] sm:$0xf] }
 0x2e6   :  { %v2304_v36 = vmul.f32 -1.442695, %v1395_v60  ;;  %v1380_v52 = vpop.f32.mrf.mxu1  ;;  %v2387_v60 = vor.u32 %v2559_v43, %v2386_v12  ;;  %v2380_v24 = vld [vmem:[#allocation10 + $0x88] sm:$0xf0]  ;;  %v2379_v56 = vor.u32 %v2557_v14, %v2378_v58  ;;  %v2346_v43 = vld [vmem:[#allocation10 + $0x40] sm:$0xf] }
 0x2e7   :  { %v2306_v5 = vmul.f32 -1.442695, %v1398_v16  ;;  %v2556_v16 = vld [vmem:[#allocation10 + $0x84] sm:$0xf]  ;;  %1869 = vmatpush.bf16.msrb.mxu2 %v2391_v10  ;;  %v2549_v59 = vld [vmem:[#allocation10 + $0x44] sm:$0xf0] }
 0x2e8   :  { %v2630_v8 = vpop.eup %2629  ;;  %2631 = vpow2.f32 %v2304_v36  ;;  %1843 = vmatpush.bf16.msra.mxu0 %v2387_v60  ;;  %v2546_v10 = vld [vmem:[#allocation10 + $0x34] sm:$0xf]  ;;  %v2340_v58 = vld [vmem:[#allocation10 + $0x38] sm:$0xf0]  ;;  %v2330_v14 = vld [vmem:[#allocation10 + $0x20] sm:$0xf] }
 0x2e9   :  { %v3212_v29 = vadd.f32 1.0, %v2630_v8  ;;  %2633 = vpow2.f32 %v2306_v5  ;;  %v2383_v5 = vor.u32 %v2556_v16, %v2380_v24  ;;  %v2343_v16 = vor.u32 %v2546_v10, %v2340_v58  ;;  %v2545_v24 = vld [vmem:[#allocation10 + $0x24] sm:$0xf0] }
 0x2eb   :  { %2635 = vrcp.f32 %v3212_v29  ;;  %v1354_v48 = vpop.f32.mrf.mxu3  ;;  %vm1427_vm2 = vweird.f32 %v3212_v29  ;;  %v1431_v37 = vand.u32 2147483647, %v3212_v29  ;;  %v1433_v38 = vand.u32 2147483648, %v3212_v29  ;;  %1870 = vmatpush.bf16.msrb.mxu2 %v2383_v5  ;;  %v3302_v5 = vld [vmem:[#allocation24_spill] sm:$0xff] }
 0x2ec   :  { %v1393_v11 = vpop.f32.mrf.mxu2  ;;  %1844 = vmatpush.bf16.msra.mxu0 %v2379_v56  ;;  %v2331_v56 = vor.u32 %v2545_v24, %v2330_v14 }
 0x2ed   :  { %vm1432_vm5 = vcmp.eq.f32.partialorder %v1431_v37, 8.507059e+37  ;;  %v1434_v36 = vor.u32 1.1754944e-38, %v1433_v38  ;;  %v2347_v37 = vor.u32 %v2549_v59, %v2346_v43  ;;  %v2348_v38 = vld [vmem:[#allocation10 + $0x48] sm:$0xf0] }
 0x2ee   :  { %v2632_v63 = vpop.eup %2631 }
 0x2ef   :  { %v2634_v39 = vpop.eup %2633  ;;  %v3215_v45 = vadd.f32 1.0, %v2632_v63 }
 0x2f0   :  { %v3217_v32 = vadd.f32 1.0, %v2634_v39 }
 0x2f1   :  { %v2636_v6 = vpop.eup %2635  ;;  %2637 = vrcp.f32 %v3215_v45  ;;  %v1414_v57 = vand.u32 2147483648, %v3215_v45  ;;  %v1412_v35 = vand.u32 2147483647, %v3215_v45  ;;  %vm1408_vm6 = vweird.f32 %v3215_v45 }
 0x2f2   :  { %v1423_v26 = vmul.f32 %v2636_v6, %v3212_v29  ;;  %2639 = vrcp.f32 %v3217_v32  ;;  %vm1428_vm1 = vweird.f32 %v2636_v6  ;;  %v1453_v3 = vand.u32 2147483648, %v3217_v32 }
 0x2f3   :  { %vm3229_vm3 = vmor %vm1427_vm2, %vm1428_vm1  ;;  %2641 = vtanh.f32 %v1397_v23  ;;  %v1415_v9 = vor.u32 1.1754944e-38, %v1414_v57  ;;  %vm1413_vm8 = vcmp.eq.f32.partialorder %v1412_v35, 8.507059e+37  ;;  %vm1447_vm10 = vweird.f32 %v3217_v32  ;;  %v2547_v57 = vld [vmem:[#allocation10 + $0x34] sm:$0xf0] }
 0x2f4   :  { %v1424_v47 = vsub.f32 1.0, %v1423_v26  ;;  %v1451_v49 = vand.u32 2147483647, %v3217_v32  ;;  %v1454_v39 = vor.u32 1.1754944e-38, %v1453_v3  ;;  %v1625_v26 = vpack.c.bf16 %v3162_v53, %v3162_v53  ;;  %v2551_v53 = vld [vmem:[#allocation10 + $0x54] sm:$0xf0] }
 0x2f5   :  { %v2355_v12 = vor.u32 %v2551_v53, %v2354_v62 }
 0x2f6   :  { %v1425_v44 = vmul.f32 %v2636_v6, %v1424_v47  ;;  %vm1452_vm12 = vcmp.eq.f32.partialorder %v1451_v49, 8.507059e+37  ;;  %v2372_v47 = vld [vmem:[#allocation10 + $0x78] sm:$0xf0] }
 0x2f7   :  { %v2638_v13 = vpop.eup %2637  ;;  %1826 = vmatpush.bf16.msrb.mxu3 %v2355_v12 }
 0x2f8   :  { %v2640_v21 = vpop.eup %2639  ;;  %v1426_v22 = vadd.f32 %v2636_v6, %v1425_v44  ;;  %v1404_v27 = vmul.f32 %v2638_v13, %v3215_v45  ;;  %vm1409_vm4 = vweird.f32 %v2638_v13  ;;  %v2367_v44 = vor.u32 %v2552_v20, %v2364_v34 }
 0x2f9   :  { %v1443_v41 = vmul.f32 %v2640_v21, %v3217_v32  ;;  %vm1410_vm7 = vmor %vm1408_vm6, %vm1409_vm4  ;;  %v2642_v30 = vpop.eup %2641  ;;  %vm1448_vm9 = vweird.f32 %v2640_v21  ;;  %v2554_v32 = vld [vmem:[#allocation10 + $0x74] sm:$0xf] }
 0x2fa   :  { %v1405_v46 = vsub.f32 1.0, %v1404_v27  ;;  %v1430_v1 = vsel %vm3229_vm3, %v2636_v6, %v1426_v22  ;;  %vm1449_vm11 = vmor %vm1447_vm10, %vm1448_vm9  ;;  %v2375_v40 = vor.u32 %v2554_v32, %v2372_v47 }
 0x2fb   :  { %v1444_v52 = vsub.f32 1.0, %v1443_v41  ;;  %v1435_v8 = vsel %vm1432_vm5, %v1434_v36, %v1430_v1  ;;  %v2351_v41 = vor.u32 %v2548_v15, %v2348_v38  ;;  %1827 = vmatpush.bf16.msrb.mxu3 %v2347_v37  ;;  %v2544_v1 = vld [vmem:[#allocation10 + $0x24] sm:$0xf]  ;;  %v3301_v36 = vld [vmem:[#allocation21_spill] sm:$0xff] }
 0x2fc   :  { %v1406_v33 = vmul.f32 %v2638_v13, %v1405_v46  ;;  %v1457_v51 = vmul.f32 %v1435_v8, %v3204_v19  ;;  %1850 = vmatpush.bf16.msrb.mxu1 %v2375_v40  ;;  %v2338_v46 = vld [vmem:[#allocation10 + $0x30] sm:$0xf] }
 0x2fd   :  { %v1445_v50 = vmul.f32 %v2640_v21, %v1444_v52  ;;  %v2339_v60 = vor.u32 %v2547_v57, %v2338_v46 }
 0x2fe   :  { %v1407_v55 = vadd.f32 %v2638_v13, %v1406_v33  ;;  %v2332_v33 = vld [vmem:[#allocation10 + $0x28] sm:$0xf0] }
 0x2ff   :  { %v1446_v11 = vadd.f32 %v2640_v21, %v1445_v50  ;;  %1828 = vmatpush.bf16.msrb.mxu3 %v2339_v60 }
 0x300   :  { %v1411_v29 = vsel %vm1410_vm7, %v2638_v13, %v1407_v55  ;;  %1851 = vmatpush.bf16.msrb.mxu1 %v2367_v44  ;;  %v2356_v13 = vld [vmem:[#allocation10 + $0x58] sm:$0xf0] }
 0x301   :  { %v1416_v31 = vsel %vm1413_vm8, %v1415_v9, %v1411_v29  ;;  %v1450_v63 = vsel %vm1449_vm11, %v2640_v21, %v1446_v11  ;;  %v2359_v2 = vor.u32 %v2550_v61, %v2356_v13  ;;  %v3300_v21 = vld [vmem:[#allocation22_spill] sm:$0xff]  ;;  %v2335_v29 = vor.u32 %v2544_v1, %v2332_v33  ;;  %v2324_v11 = vld [vmem:[#allocation10 + $0x18] sm:$0xf0] }
 0x302   :  { %v1458_v7 = vmul.f32 %v2642_v30, %v1416_v31  ;;  %v1455_v45 = vsel %vm1452_vm12, %v1454_v39, %v1450_v63  ;;  %v2322_v30 = vld [vmem:[#allocation10 + $0x10] sm:$0xf]  ;;  %v2543_v31 = vld [vmem:[#allocation10 + $0x14] sm:$0xf0] }
 0x303   :  { %1829 = vmatpush.bf16.msrb.mxu3 %v2331_v56  ;;  %v2323_v63 = vor.u32 %v2543_v31, %v2322_v30  ;;  %v3303_v13 = vld [vmem:[#allocation23_spill] sm:$0xff] }
 0x304   :  { %v3239_v48 = vadd.f32 %v1458_v7, %v1457_v51  ;;  %1852 = vmatpush.bf16.msrb.mxu1 %v2359_v2  ;;  %v2542_v7 = vld [vmem:[#allocation10 + $0x14] sm:$0xf] }
 0x306   :  { %2643 = vtanh.f32 %v3239_v48 }
 0x307   :  { %1830 = vmatpush.bf16.msrb.mxu3 %v2323_v63 }
 0x308   :  { %1853 = vmatpush.bf16.msrb.mxu1 %v2351_v41 }
 0x30c   :  { %v2644_v19 = vpop.eup %2643  ;;  %1854 = vmatpush.bf16.msrb.mxu1 %v2343_v16 }
 0x30d   :  { %v1461_v6 = vmul.f32 %v2644_v19, %v1455_v45  ;;  %v2327_v19 = vor.u32 %v2542_v7, %v2324_v11  ;;  %v2314_v45 = vld [vmem:[#allocation10] sm:$0xf] }
 0x30f   :  { %v1462_v4 = vpack.c.bf16 %v1461_v6, %v1461_v6  ;;  %v2541_v6 = vld [vmem:[#allocation10 + $0x4] sm:$0xf0] }
 0x310   :  { %1855 = vmatpush.bf16.msrb.mxu1 %v2335_v29  ;;  %v2315_v32 = vor.u32 %v2541_v6, %v2314_v45 }
 0x311   :  { %1471 = vmatmul.bf16.vlgmr.msra.gmra.mxu3 %v1462_v4  ;;  %1484 = vmatmul.bf16.vlgmr.msrb.gmra.mxu0 %v1462_v4 }
 0x312   :  { %1497 = vmatmul.bf16.vlgmr.msra.gmra.mxu1 %v1462_v4  ;;  %1510 = vmatmul.bf16.vlgmr.msra.gmra.mxu2 %v1462_v4  ;;  %v2540_v4 = vld [vmem:[#allocation10 + $0x4] sm:$0xf] }
 0x313   :  { %1831 = vmatpush.bf16.msrb.mxu3 %v2315_v32 }
 0x314   :  { %1856 = vmatpush.bf16.msrb.mxu1 %v2327_v19 }
 0x321   :  { %1845 = vmatmul.bf16.vlgmr.msra.gmra.mxu0 %v1625_v26 }
 0x322   :  { %1871 = vmatmul.bf16.vlgmr.msrb.gmra.mxu2 %v1625_v26  ;;  %v2316_v26 = vld [vmem:[#allocation10 + $0x8] sm:$0xf0] }
 0x323   :  { %v2319_v47 = vor.u32 %v2540_v4, %v2316_v26 }
 0x325   :  { %1857 = vmatpush.bf16.msrb.mxu1 %v2319_v47 }
 0x38e   :  { %v1485_v23 = vpop.f32.mrf.mxu0 }
 0x38f   :  { %v1516_v22 = vadd.f32 %v1485_v23, %v3300_v21  ;;  %v3248_v27 = vpop.f32.mrf.mxu1 }
 0x390   :  { %v1517_v2 = vadd.f32 %v3248_v27, %v3303_v13 }
 0x391   :  { %v2308_v42 = vmul.f32 -1.442695, %v1516_v22 }
 0x393   :  { %2645 = vpow2.f32 %v2308_v42 }
 0x394   :  { %v1472_v35 = vpop.f32.mrf.mxu3 }
 0x395   :  { %v1515_v52 = vadd.f32 %v1472_v35, %v3301_v36  ;;  %v1511_v55 = vpop.f32.mrf.mxu2 }
 0x396   :  { %v1518_v8 = vadd.f32 %v1511_v55, %v3302_v5  ;;  %v1487_v9 = vpop.f32.mrf.mxu0 }
 0x397   :  { %v2307_v50 = vmul.f32 -1.442695, %v1515_v52  ;;  %v1500_v51 = vpop.f32.mrf.mxu1 }
 0x398   :  { %v2309_v3 = vmul.f32 -1.442695, %v1518_v8 }
 0x399   :  { %v2646_v49 = vpop.eup %2645  ;;  %2647 = vpow2.f32 %v2307_v50 }
 0x39a   :  { %v1541_v39 = vadd.f32 1.0, %v2646_v49  ;;  %2649 = vpow2.f32 %v2309_v3 }
 0x39c   :  { %2651 = vrcp.f32 %v1541_v39  ;;  %v1474_v18 = vpop.f32.mrf.mxu3  ;;  %v1553_v15 = vand.u32 2147483648, %v1541_v39  ;;  %vm1547_vm14 = vweird.f32 %v1541_v39  ;;  %v1551_v22 = vand.u32 2147483647, %v1541_v39 }
 0x39d   :  { %v1513_v25 = vpop.f32.mrf.mxu2 }
 0x39e   :  { %v3252_v17 = vpop.f32.mrf.mxu0  ;;  %v1554_v60 = vor.u32 1.1754944e-38, %v1553_v15  ;;  %vm1552_vm1 = vcmp.eq.f32.partialorder %v1551_v22, 8.507059e+37 }
 0x39f   :  { %v2648_v40 = vpop.eup %2647 }
 0x3a0   :  { %v2650_v54 = vpop.eup %2649  ;;  %v1522_v28 = vadd.f32 1.0, %v2648_v40 }
 0x3a1   :  { %v1561_v20 = vadd.f32 1.0, %v2650_v54 }
 0x3a2   :  { %v2652_v0 = vpop.eup %2651  ;;  %2653 = vrcp.f32 %v1522_v28  ;;  %v1534_v41 = vand.u32 2147483648, %v1522_v28  ;;  %v1532_v27 = vand.u32 2147483647, %v1522_v28  ;;  %vm1528_vm2 = vweird.f32 %v1522_v28 }
 0x3a3   :  { %v1543_v34 = vmul.f32 %v2652_v0, %v1541_v39  ;;  %2655 = vrcp.f32 %v1561_v20  ;;  %vm1548_vm13 = vweird.f32 %v2652_v0  ;;  %v1573_v5 = vand.u32 2147483648, %v1561_v20 }
 0x3a4   :  { %vm3256_vm15 = vmor %vm1547_vm14, %vm1548_vm13  ;;  %2657 = vtanh.f32 %v1517_v2  ;;  %v1535_v14 = vor.u32 1.1754944e-38, %v1534_v41  ;;  %vm1533_vm4 = vcmp.eq.f32.partialorder %v1532_v27, 8.507059e+37  ;;  %vm1567_vm6 = vweird.f32 %v1561_v20 }
 0x3a5   :  { %v1544_v44 = vsub.f32 1.0, %v1543_v34  ;;  %v1872_v62 = vpop.f32.mrf.mxu2  ;;  %v1571_v8 = vand.u32 2147483647, %v1561_v20  ;;  %v1574_v29 = vor.u32 1.1754944e-38, %v1573_v5 }
 0x3a6   :  { %v1848_v53 = vpop.f32.mrf.mxu0 }
 0x3a7   :  { %v1545_v61 = vmul.f32 %v2652_v0, %v1544_v44  ;;  %vm1572_vm8 = vcmp.eq.f32.partialorder %v1571_v8, 8.507059e+37 }
 0x3a8   :  { %v2654_v12 = vpop.eup %2653 }
 0x3a9   :  { %v2656_v23 = vpop.eup %2655  ;;  %v1546_v43 = vadd.f32 %v2652_v0, %v1545_v61  ;;  %v1524_v59 = vmul.f32 %v2654_v12, %v1522_v28  ;;  %vm1529_vm0 = vweird.f32 %v2654_v12 }
 0x3aa   :  { %v1563_v21 = vmul.f32 %v2656_v23, %v1561_v20  ;;  %vm1530_vm3 = vmor %vm1528_vm2, %vm1529_vm0  ;;  %v2658_v1 = vpop.eup %2657  ;;  %vm1568_vm5 = vweird.f32 %v2656_v23 }
 0x3ab   :  { %v1525_v37 = vsub.f32 1.0, %v1524_v59  ;;  %v1550_v42 = vsel %vm3256_vm15, %v2652_v0, %v1546_v43  ;;  %vm1569_vm7 = vmor %vm1567_vm6, %vm1568_vm5 }
 0x3ac   :  { %v1564_v10 = vsub.f32 1.0, %v1563_v21  ;;  %v1555_v16 = vsel %vm1552_vm1, %v1554_v60, %v1550_v42 }
 0x3ad   :  { %v1526_v46 = vmul.f32 %v2654_v12, %v1525_v37  ;;  %v1874_v57 = vpop.f32.mrf.mxu2  ;;  %v1577_v36 = vmul.f32 %v1555_v16, %v3239_v48  ;;  %v1658_v48 = vld [vmem:[%s3282_s9] sm:$0x3] }
 0x3ae   :  { %v1565_v35 = vmul.f32 %v2656_v23, %v1564_v10  ;;  %v1661_v7 = vperm.slane %v1658_v48, 1  ;;  %v1660_v63 = vperm.slane %v1658_v48, 0 }
 0x3af   :  { %v1527_v58 = vadd.f32 %v2654_v12, %v1526_v46 }
 0x3b0   :  { %v1566_v56 = vadd.f32 %v2656_v23, %v1565_v35 }
 0x3b1   :  { %v1531_v24 = vsel %vm1530_vm3, %v2654_v12, %v1527_v58 }
 0x3b2   :  { %v1536_v33 = vsel %vm1533_vm4, %v1535_v14, %v1531_v24  ;;  %v1570_v9 = vsel %vm1569_vm7, %v2656_v23, %v1566_v56 }
 0x3b3   :  { %v1578_v52 = vmul.f32 %v2658_v1, %v1536_v33  ;;  %v1575_v31 = vsel %vm1572_vm8, %v1574_v29, %v1570_v9 }
 0x3b5   :  { %v1579_v55 = vadd.f32 %v1578_v52, %v1577_v36 }
 0x3b7   :  { %2659 = vtanh.f32 %v1579_v55 }
 0x3bd   :  { %v2660_v30 = vpop.eup %2659 }
 0x3be   :  { %v1581_v50 = vmul.f32 %v2660_v30, %v1575_v31 }
 0x3c0   :  { %v1624_v51 = vpack.c.bf16 %v1581_v50, %v1581_v50 }
 0x3c2   :  { %1832 = vmatmul.bf16.vlgmr.msrb.gmra.mxu3 %v1624_v51  ;;  %1858 = vmatmul.bf16.vlgmr.msrb.gmra.mxu1 %v1624_v51 }
 0x43f   :  { %v1859_v11 = vpop.f32.mrf.mxu1 }
 0x440   :  { %v1860_v3 = vadd.f32 %v1859_v11, %v1661_v7 }
 0x442   :  { %v1873_v49 = vadd.f32 %v1872_v62, %v1860_v3 }
 0x444   :  { %1877 = vst [vmem:[%s3283_s10 + $0x8] sm:$0xff] %v1873_v49 }
 0x445   :  { %v1833_v39 = vpop.f32.mrf.mxu3 }
 0x446   :  { %v1834_v19 = vadd.f32 %v1833_v39, %v1660_v63 }
 0x447   :  { %v1861_v45 = vpop.f32.mrf.mxu1 }
 0x448   :  { %v1847_v6 = vadd.f32 %v3252_v17, %v1834_v19 }
 0x44a   :  { %1876 = vst [vmem:[%s3283_s10] sm:$0xff] %v1847_v6 }
 0x44d   :  { %v1835_v4 = vpop.f32.mrf.mxu3 }
 0x44e   :  { %1882 = vsyncpa [#allocation3], 1 }
 0x44f   :  { %1883 = vsyncpa [#allocation5], 1 }
 0x450   :  { %1884 = vsyncpa [#allocation8], 1 }
 0x451   :  { %1885 = vsyncpa [#allocation11], 1 }

</bundles_post_ra>
